<compile_context>
chip_gen: v6e
topology: v6e:2x2x1
jax: 0.10.0
libtpu: 0.0.40
codegen_flags: <defaults>
</compile_context>

<pallas_src>
import jax
import jax.numpy as jnp
from jax import lax
from jax.experimental import pallas as pl
from jax.experimental.pallas import tpu as pltpu

# ---------------- model hyper-parameters (small, synthetic) ----------------
VOCAB = 16
PAD_IDX = 1
MASK_IDX = 15
SOS_IDX = 0
EOS_IDX = 2

B = 2            # batch
S = 8            # sequence length
D = 32           # embedding_dim
HEADS = 4
DH = D // HEADS  # 8
FFN = 4 * D      # 128
NUM_LAYERS = 2
NEG_INF = -1e9
LN_EPS = 1e-5
NVEC = 8         # packed per-layer (D,)-vectors: g1, bln1, bo, g2, bln2, b2, pad, pad


# --------------------------- Pallas kernel ---------------------------------
def _ln(x, g, b):
    # x: (S, D); g, b: (1, D)
    mu = jnp.mean(x, axis=-1, keepdims=True)
    var = jnp.mean((x - mu) ** 2, axis=-1, keepdims=True)
    return (x - mu) * lax.rsqrt(var + LN_EPS) * g + b


def embedder_kernel(tok_ref, emb_ref, wqkv_ref, bqkv_ref, wo_ref, vec_ref,
                    w1_ref, b1_ref, w2_ref, out_ref, x_ref):
    # grid = (batch, layer); the layer axis is the inner ("arbitrary") loop so
    # x_ref (VMEM scratch) carries the activation across layers for this row.
    layer = pl.program_id(1)
    last_layer = pl.num_programs(1) - 1

    tok_col = tok_ref[0]                                    # (S, 1) int32
    valid_col = (tok_col != PAD_IDX).astype(jnp.float32)    # (S, 1): 1.0 valid key

    # ---- layer 0: fused embedding lookup (one-hot @ table). The pad row of
    #      the table is zero, matching nn.Embedding(padding_idx=pad_idx). ----
    @pl.when(layer == 0)
    def _init():
        oh = (tok_col == lax.broadcasted_iota(jnp.int32, (S, VOCAB), 1)
              ).astype(jnp.float32)                          # (S, VOCAB)
        x_ref[...] = jnp.dot(oh, emb_ref[...],
                             preferred_element_type=jnp.float32)   # (S, D)

    x = x_ref[...]                                           # (S, D)

    vecs = vec_ref[0]                                        # (NVEC, D)
    g1, bln1 = vecs[0:1], vecs[1:2]
    bo = vecs[2:3]
    g2, bln2 = vecs[3:4], vecs[4:5]
    b2 = vecs[5:6]

    # ---- multi-head self-attention (pre-norm), all heads batched ----
    h = _ln(x, g1, bln1)                                     # (S, D)
    hb = jnp.broadcast_to(h[None], (3 * HEADS, S, D))        # (3H, S, D)
    qkv = lax.dot_general(hb, wqkv_ref[0],                   # (3H, D, DH)
                          dimension_numbers=(((2,), (1,)), ((0,), (0,))),
                          preferred_element_type=jnp.float32)  # (3H, S, DH)
    qkv = qkv + bqkv_ref[0]                                  # + (3H, 1, DH)
    q = qkv[0:HEADS]                                         # (H, S, DH)
    k = qkv[HEADS:2 * HEADS]
    v = qkv[2 * HEADS:3 * HEADS]

    scale = 1.0 / (DH ** 0.5)
    scores = lax.dot_general(q, k,
                             dimension_numbers=(((2,), (2,)), ((0,), (0,))),
                             preferred_element_type=jnp.float32) * scale   # (H, S, S)

    # masked softmax: padded keys are excluded multiplicatively from both the
    # numerator (masked V) and the denominator -- identical to the -1e9 bias.
    # TODO(synk): if a sequence can be entirely padding, the denominator is 0;
    #             not reachable here (SOS is always a valid key).
    m = jnp.max(scores, axis=-1, keepdims=True)              # (H, S, 1)
    p = jnp.exp(scores - m)                                  # (H, S, S)
    vmask = jnp.broadcast_to(valid_col[None], (HEADS, S, DH))  # (H, K, DH)
    num = lax.dot_general(p, v * vmask,
                          dimension_numbers=(((2,), (1,)), ((0,), (0,))),
                          preferred_element_type=jnp.float32)  # (H, S, DH)
    den = lax.dot_general(p, vmask,
                          dimension_numbers=(((2,), (1,)), ((0,), (0,))),
                          preferred_element_type=jnp.float32)  # (H, S, DH)
    ctx = num * pl.reciprocal(den, approx=True)              # (H, S, DH)

    outh = lax.dot_general(ctx, wo_ref[0],                   # (H, DH, D)
                           dimension_numbers=(((2,), (1,)), ((0,), (0,))),
                           preferred_element_type=jnp.float32)  # (H, S, D)
    x = x + jnp.sum(outh, axis=0) + bo                       # (S, D)

    # ---- feed-forward (pre-norm) ----
    h2 = _ln(x, g2, bln2)
    f = jnp.dot(h2, w1_ref[0], preferred_element_type=jnp.float32) + b1_ref[0]
    f = jax.nn.gelu(f, approximate=True)
    f = jnp.dot(f, w2_ref[0], preferred_element_type=jnp.float32) + b2
    x = x + f

    x_ref[...] = x

    @pl.when(layer == last_layer)
    def _finalize():
        out_ref[0] = x


# --------------------------- wrapper ----------------------------------------
def pack_layer_params(layer_params):
    """Stack per-layer params along a leading layer axis in packed form."""
    wqkv_l, bqkv_l, wo_l, vec_l, w1_l, b1_l, w2_l = [], [], [], [], [], [], []
    for (g1, bln1, wq, bq, wk, bk, wv, bv, wo, bo, g2, bln2, w1, b1, w2, b2) in layer_params:
        per_head_w = lambda w: w.reshape(D, HEADS, DH).transpose(1, 0, 2)   # (H, D, DH)
        per_head_b = lambda vb: vb.reshape(HEADS, 1, DH)                    # (H, 1, DH)
        wqkv_l.append(jnp.concatenate(
            [per_head_w(wq), per_head_w(wk), per_head_w(wv)], axis=0))      # (3H, D, DH)
        bqkv_l.append(jnp.concatenate(
            [per_head_b(bq), per_head_b(bk), per_head_b(bv)], axis=0))      # (3H, 1, DH)
        wo_l.append(wo.reshape(HEADS, DH, D))                               # (H, DH, D)
        zero = jnp.zeros_like(g1)
        vec_l.append(jnp.stack([g1, bln1, bo, g2, bln2, b2, zero, zero], axis=0))  # (NVEC, D)
        w1_l.append(w1)
        b1_l.append(b1.reshape(1, FFN))
        w2_l.append(w2)
    return (jnp.stack(wqkv_l), jnp.stack(bqkv_l), jnp.stack(wo_l), jnp.stack(vec_l),
            jnp.stack(w1_l), jnp.stack(b1_l), jnp.stack(w2_l))


@jax.jit
def embedder_forward(tokens, emb_table, wqkv, bqkv, wo_h, vecs, w1, b1, w2):
    tokens_c = tokens.reshape(B, S, 1).astype(jnp.int32)     # column form for the kernel
    return pl.pallas_call(
        embedder_kernel,
        out_shape=jax.ShapeDtypeStruct((B, S, D), jnp.float32),
        grid=(B, NUM_LAYERS),
        in_specs=[
            pl.BlockSpec((1, S, 1), lambda b, l: (b, 0, 0)),                 # tokens
            pl.BlockSpec((VOCAB, D), lambda b, l: (0, 0)),                   # embedding table
            pl.BlockSpec((1, 3 * HEADS, D, DH), lambda b, l: (l, 0, 0, 0)),  # fused Wqkv
            pl.BlockSpec((1, 3 * HEADS, 1, DH), lambda b, l: (l, 0, 0, 0)),  # fused bqkv
            pl.BlockSpec((1, HEADS, DH, D), lambda b, l: (l, 0, 0, 0)),      # Wo (per head)
            pl.BlockSpec((1, NVEC, D), lambda b, l: (l, 0, 0)),              # packed vectors
            pl.BlockSpec((1, D, FFN), lambda b, l: (l, 0, 0)),               # W1
            pl.BlockSpec((1, 1, FFN), lambda b, l: (l, 0, 0)),               # b1
            pl.BlockSpec((1, FFN, D), lambda b, l: (l, 0, 0)),               # W2
        ],
        out_specs=pl.BlockSpec((1, S, D), lambda b, l: (b, 0, 0)),
        scratch_shapes=[pltpu.VMEM((S, D), jnp.float32)],                    # resident activation
        compiler_params=pltpu.CompilerParams(
            dimension_semantics=("parallel", "arbitrary")),
    )(tokens_c, emb_table, wqkv, bqkv, wo_h, vecs, w1, b1, w2)


# --------------------------- pure-JAX reference -----------------------------
def reference_forward(tokens, emb_table, layer_params):
    valid = (tokens != PAD_IDX).astype(jnp.float32)
    key_bias = (1.0 - valid) * NEG_INF                        # (B, S)
    x = emb_table[tokens]
    for (g1, bln1, wq, bq, wk, bk, wv, bv, wo, bo, g2, bln2, w1, b1, w2, b2) in layer_params:
        def ln(z, g, b):
            mu = jnp.mean(z, axis=-1, keepdims=True)
            var = jnp.mean((z - mu) ** 2, axis=-1, keepdims=True)
            return (z - mu) * lax.rsqrt(var + LN_EPS) * g + b

        h = ln(x, g1, bln1)
        q = (h @ wq + bq).reshape(B, S, HEADS, DH)
        k = (h @ wk + bk).reshape(B, S, HEADS, DH)
        v = (h @ wv + bv).reshape(B, S, HEADS, DH)
        scores = jnp.einsum("bqhd,bkhd->bhqk", q, k) / (DH ** 0.5)
        scores = scores + key_bias[:, None, None, :]
        p = jax.nn.softmax(scores, axis=-1)
        attn = jnp.einsum("bhqk,bkhd->bqhd", p, v).reshape(B, S, D)
        x = x + (attn @ wo + bo)

        h2 = ln(x, g2, bln2)
        f = jax.nn.gelu(h2 @ w1 + b1, approximate=True)
        x = x + (f @ w2 + b2)
    return x


# --------------------------- parameter init ---------------------------------
def init_params(key):
    keys = jax.random.split(key, 1 + NUM_LAYERS)
    emb_table = jax.random.normal(keys[0], (VOCAB, D), jnp.float32) * 0.1
    emb_table = emb_table.at[PAD_IDX].set(0.0)                # nn.Embedding padding_idx

    layer_params = []
    for li in range(NUM_LAYERS):
        ks = jax.random.split(keys[1 + li], 8)
        g1 = jnp.ones((D,), jnp.float32)
        bln1 = jnp.zeros((D,), jnp.float32)
        wq = jax.random.normal(ks[0], (D, D), jnp.float32) * 0.05
        wk = jax.random.normal(ks[1], (D, D), jnp.float32) * 0.05
        wv = jax.random.normal(ks[2], (D, D), jnp.float32) * 0.05
        wo = jax.random.normal(ks[3], (D, D), jnp.float32) * 0.05
        bq = jnp.zeros((D,), jnp.float32)
        bk = jnp.zeros((D,), jnp.float32)
        bv = jnp.zeros((D,), jnp.float32)
        bo = jnp.zeros((D,), jnp.float32)
        g2 = jnp.ones((D,), jnp.float32)
        bln2 = jnp.zeros((D,), jnp.float32)
        w1 = jax.random.normal(ks[4], (D, FFN), jnp.float32) * 0.05
        b1 = jnp.zeros((FFN,), jnp.float32)
        w2 = jax.random.normal(ks[5], (FFN, D), jnp.float32) * 0.05
        b2 = jnp.zeros((D,), jnp.float32)
        layer_params.append(
            (g1, bln1, wq, bq, wk, bk, wv, bv, wo, bo, g2, bln2, w1, b1, w2, b2)
        )
    return emb_table, layer_params


# ------------------------------- main ----------------------------------------
if __name__ == "__main__":
    key = jax.random.PRNGKey(0)
    k_tok, k_par = jax.random.split(key)

    # tokens: sos ... eos with trailing pad in one row
    tokens = jax.random.randint(k_tok, (B, S), 3, VOCAB - 1, dtype=jnp.int32)
    tokens = tokens.at[:, 0].set(SOS_IDX)
    tokens = tokens.at[0, S - 1].set(EOS_IDX)
    tokens = tokens.at[1, S - 3].set(EOS_IDX)
    tokens = tokens.at[1, S - 2:].set(PAD_IDX)   # padded positions in row 1

    emb_table, layer_params = init_params(k_par)
    packed = pack_layer_params(layer_params)

    out = embedder_forward(tokens, emb_table, *packed)
    out = jax.block_until_ready(out)

    ref = reference_forward(tokens, emb_table, layer_params)
    assert out.shape == (B, S, D)
    # tolerance loosened slightly for pl.reciprocal(approx=True) in the softmax
    assert jnp.allclose(out, ref, atol=2e-3, rtol=2e-3), (
        f"max abs err {jnp.max(jnp.abs(out - ref))}"
    )

    print("KERNEL_OK")
</pallas_src>

<mosaic_0001>
module attributes {stable_mosaic.version = 11 : i64} {
  func.func @embedder_kernel(%arg0: i32, %arg1: i32, %arg2: memref<1x8x1xi32, #tpu.memory_space<vmem>>, %arg3: memref<16x32xf32, #tpu.memory_space<vmem>>, %arg4: memref<1x12x32x8xf32, #tpu.memory_space<vmem>>, %arg5: memref<1x12x1x8xf32, #tpu.memory_space<vmem>>, %arg6: memref<1x4x8x32xf32, #tpu.memory_space<vmem>>, %arg7: memref<1x8x32xf32, #tpu.memory_space<vmem>>, %arg8: memref<1x32x128xf32, #tpu.memory_space<vmem>>, %arg9: memref<1x1x128xf32, #tpu.memory_space<vmem>>, %arg10: memref<1x128x32xf32, #tpu.memory_space<vmem>>, %arg11: memref<1x8x32xf32, #tpu.memory_space<vmem>>, %arg12: memref<8x32xf32, #tpu.memory_space<vmem>>) attributes {dimension_semantics = [#tpu.dimension_semantics<parallel>, #tpu.dimension_semantics<arbitrary>], iteration_bounds = array<i64: 2, 2>, scalar_prefetch = 0 : i64, scratch_operands = 1 : i64, tpu.core_type = #tpu.core_type<tc>, window_params = [{transform_indices = @transform_0, window_bounds = array<i64: 1, 8, 1>}, {pipeline_mode = #tpu.pipeline_mode<synchronous>, transform_indices = @transform_1, window_bounds = array<i64: 16, 32>}, {transform_indices = @transform_2, window_bounds = array<i64: 1, 12, 32, 8>}, {transform_indices = @transform_3, window_bounds = array<i64: 1, 12, 1, 8>}, {transform_indices = @transform_4, window_bounds = array<i64: 1, 4, 8, 32>}, {transform_indices = @transform_5, window_bounds = array<i64: 1, 8, 32>}, {transform_indices = @transform_6, window_bounds = array<i64: 1, 32, 128>}, {transform_indices = @transform_7, window_bounds = array<i64: 1, 1, 128>}, {transform_indices = @transform_8, window_bounds = array<i64: 1, 128, 32>}, {transform_indices = @transform_9, window_bounds = array<i64: 1, 8, 32>}]} {
    %c0 = arith.constant 0 : index
    %c0_0 = arith.constant 0 : index
    %c0_1 = arith.constant 0 : index
    %0 = vector.load %arg2[%c0, %c0_0, %c0_1] : memref<1x8x1xi32, #tpu.memory_space<vmem>>, vector<1x8x1xi32>
    %1 = vector.shape_cast %0 : vector<1x8x1xi32> to vector<8x1xi32>
    %c1_i32 = arith.constant 1 : i32
    %2 = vector.broadcast %c1_i32 : i32 to vector<8x1xi32>
    %3 = arith.cmpi ne, %1, %2 : vector<8x1xi32>
    %4 = arith.extui %3 : vector<8x1xi1> to vector<8x1xi32>
    %5 = arith.sitofp %4 : vector<8x1xi32> to vector<8x1xf32>
    %c0_i32 = arith.constant 0 : i32
    %6 = arith.cmpi eq, %arg1, %c0_i32 : i32
    %7 = arith.extui %6 : i1 to i32
    %c0_i32_2 = arith.constant 0 : i32
    %8 = arith.cmpi ne, %7, %c0_i32_2 : i32
    scf.if %8 {
      %128 = tpu.iota {dimensions = array<i32: 1>} : vector<8x16xi32>
      %129 = vector.broadcast %1 : vector<8x1xi32> to vector<8x16xi32>
      %130 = arith.cmpi eq, %129, %128 : vector<8x16xi32>
      %131 = arith.extui %130 : vector<8x16xi1> to vector<8x16xi32>
      %132 = arith.sitofp %131 : vector<8x16xi32> to vector<8x16xf32>
      %c0_56 = arith.constant 0 : index
      %c0_57 = arith.constant 0 : index
      %133 = vector.load %arg3[%c0_56, %c0_57] : memref<16x32xf32, #tpu.memory_space<vmem>>, vector<16x32xf32>
      %cst_58 = arith.constant dense<0.000000e+00> : vector<8x32xf32>
      %134 = tpu.matmul %132, %133, %cst_58 {dimension_numbers = #tpu.dot_dimension_numbers<[1], [0], [0], [1], [0, 0, 1, 1], [], []>} : vector<8x16xf32>, vector<16x32xf32>, vector<8x32xf32> -> vector<8x32xf32>
      %c0_59 = arith.constant 0 : index
      %c0_60 = arith.constant 0 : index
      %135 = vector.load %arg12[%c0_59, %c0_60] : memref<8x32xf32, #tpu.memory_space<vmem>>, vector<8x32xf32>
      tpu.vector_store %arg12[%c0_59, %c0_60], %134 {strides = array<i32>} : memref<8x32xf32, #tpu.memory_space<vmem>>, vector<8x32xf32>,
    } else {
    }
    %c0_3 = arith.constant 0 : index
    %c0_4 = arith.constant 0 : index
    %9 = vector.load %arg12[%c0_3, %c0_4] : memref<8x32xf32, #tpu.memory_space<vmem>>, vector<8x32xf32>
    %c0_5 = arith.constant 0 : index
    %c0_6 = arith.constant 0 : index
    %c0_7 = arith.constant 0 : index
    %10 = vector.load %arg7[%c0_5, %c0_6, %c0_7] : memref<1x8x32xf32, #tpu.memory_space<vmem>>, vector<1x8x32xf32>
    %11 = vector.shape_cast %10 : vector<1x8x32xf32> to vector<8x32xf32>
    %12 = vector.extract_strided_slice %11 {offsets = [0, 0], sizes = [1, 32], strides = [1, 1]} : vector<8x32xf32> to vector<1x32xf32>
    %13 = vector.extract_strided_slice %11 {offsets = [1, 0], sizes = [1, 32], strides = [1, 1]} : vector<8x32xf32> to vector<1x32xf32>
    %14 = vector.extract_strided_slice %11 {offsets = [2, 0], sizes = [1, 32], strides = [1, 1]} : vector<8x32xf32> to vector<1x32xf32>
    %15 = vector.extract_strided_slice %11 {offsets = [3, 0], sizes = [1, 32], strides = [1, 1]} : vector<8x32xf32> to vector<1x32xf32>
    %16 = vector.extract_strided_slice %11 {offsets = [4, 0], sizes = [1, 32], strides = [1, 1]} : vector<8x32xf32> to vector<1x32xf32>
    %17 = vector.extract_strided_slice %11 {offsets = [5, 0], sizes = [1, 32], strides = [1, 1]} : vector<8x32xf32> to vector<1x32xf32>
    %cst = arith.constant dense<0.000000e+00> : vector<8xf32>
    %18 = vector.multi_reduction <add>, %9, %cst [1] : vector<8x32xf32> to vector<8xf32>
    %19 = vector.shape_cast %18 : vector<8xf32> to vector<8x1xf32>
    %cst_8 = arith.constant 3.200000e+01 : f32
    %20 = vector.broadcast %cst_8 : f32 to vector<8x1xf32>
    %21 = arith.divf %19, %20 : vector<8x1xf32>
    %22 = vector.broadcast %21 : vector<8x1xf32> to vector<8x32xf32>
    %23 = arith.subf %9, %22 : vector<8x32xf32>
    %24 = arith.mulf %23, %23 : vector<8x32xf32>
    %cst_9 = arith.constant dense<0.000000e+00> : vector<8xf32>
    %25 = vector.multi_reduction <add>, %24, %cst_9 [1] : vector<8x32xf32> to vector<8xf32>
    %26 = vector.shape_cast %25 : vector<8xf32> to vector<8x1xf32>
    %cst_10 = arith.constant 3.200000e+01 : f32
    %27 = vector.broadcast %cst_10 : f32 to vector<8x1xf32>
    %28 = arith.divf %26, %27 : vector<8x1xf32>
    %29 = vector.broadcast %21 : vector<8x1xf32> to vector<8x32xf32>
    %30 = arith.subf %9, %29 : vector<8x32xf32>
    %cst_11 = arith.constant 9.99999974E-6 : f32
    %31 = vector.broadcast %cst_11 : f32 to vector<8x1xf32>
    %32 = arith.addf %28, %31 : vector<8x1xf32>
    %33 = math.rsqrt %32 : vector<8x1xf32>
    %34 = vector.broadcast %33 : vector<8x1xf32> to vector<8x32xf32>
    %35 = arith.mulf %30, %34 : vector<8x32xf32>
    %36 = vector.broadcast %12 : vector<1x32xf32> to vector<8x32xf32>
    %37 = arith.mulf %35, %36 : vector<8x32xf32>
    %38 = vector.broadcast %13 : vector<1x32xf32> to vector<8x32xf32>
    %39 = arith.addf %37, %38 : vector<8x32xf32>
    %40 = vector.shape_cast %39 : vector<8x32xf32> to vector<1x8x32xf32>
    %41 = vector.shape_cast %40 : vector<1x8x32xf32> to vector<1x8x32xf32>
    %42 = vector.broadcast %41 : vector<1x8x32xf32> to vector<12x8x32xf32>
    %c0_12 = arith.constant 0 : index
    %c0_13 = arith.constant 0 : index
    %c0_14 = arith.constant 0 : index
    %c0_15 = arith.constant 0 : index
    %43 = vector.load %arg4[%c0_12, %c0_13, %c0_14, %c0_15] : memref<1x12x32x8xf32, #tpu.memory_space<vmem>>, vector<1x12x32x8xf32>
    %44 = vector.shape_cast %43 : vector<1x12x32x8xf32> to vector<12x32x8xf32>
    %cst_16 = arith.constant dense<0.000000e+00> : vector<12x8x8xf32>
    %45 = tpu.matmul %42, %44, %cst_16 {dimension_numbers = #tpu.dot_dimension_numbers<[2], [1], [1], [2], [0, 0, 0, 1, 1, 2], [0], [0]>} : vector<12x8x32xf32>, vector<12x32x8xf32>, vector<12x8x8xf32> -> vector<12x8x8xf32>
    %c0_17 = arith.constant 0 : index
    %c0_18 = arith.constant 0 : index
    %c0_19 = arith.constant 0 : index
    %c0_20 = arith.constant 0 : index
    %46 = vector.load %arg5[%c0_17, %c0_18, %c0_19, %c0_20] : memref<1x12x1x8xf32, #tpu.memory_space<vmem>>, vector<1x12x1x8xf32>
    %47 = vector.shape_cast %46 : vector<1x12x1x8xf32> to vector<12x1x8xf32>
    %48 = vector.broadcast %47 : vector<12x1x8xf32> to vector<12x8x8xf32>
    %49 = arith.addf %45, %48 : vector<12x8x8xf32>
    %50 = vector.extract_strided_slice %49 {offsets = [0, 0, 0], sizes = [4, 8, 8], strides = [1, 1, 1]} : vector<12x8x8xf32> to vector<4x8x8xf32>
    %51 = vector.extract_strided_slice %49 {offsets = [4, 0, 0], sizes = [4, 8, 8], strides = [1, 1, 1]} : vector<12x8x8xf32> to vector<4x8x8xf32>
    %52 = vector.extract_strided_slice %49 {offsets = [8, 0, 0], sizes = [4, 8, 8], strides = [1, 1, 1]} : vector<12x8x8xf32> to vector<4x8x8xf32>
    %cst_21 = arith.constant dense<0.000000e+00> : vector<4x8x8xf32>
    %53 = tpu.matmul %50, %51, %cst_21 {dimension_numbers = #tpu.dot_dimension_numbers<[2], [2], [1], [1], [0, 0, 0, 1, 1, 1], [0], [0]>} : vector<4x8x8xf32>, vector<4x8x8xf32>, vector<4x8x8xf32> -> vector<4x8x8xf32>
    %cst_22 = arith.constant 0.353553385 : f32
    %54 = vector.broadcast %cst_22 : f32 to vector<4x8x8xf32>
    %55 = arith.mulf %53, %54 : vector<4x8x8xf32>
    %cst_23 = arith.constant dense<0xFF800000> : vector<4x8xf32>
    %56 = vector.multi_reduction <maximumf>, %55, %cst_23 [2] : vector<4x8x8xf32> to vector<4x8xf32>
    %57 = vector.shape_cast %56 : vector<4x8xf32> to vector<4x8x1xf32>
    %58 = vector.broadcast %57 : vector<4x8x1xf32> to vector<4x8x8xf32>
    %59 = arith.subf %55, %58 : vector<4x8x8xf32>
    %60 = math.exp %59 : vector<4x8x8xf32>
    %61 = vector.shape_cast %5 : vector<8x1xf32> to vector<1x8x1xf32>
    %62 = vector.shape_cast %61 : vector<1x8x1xf32> to vector<1x8x1xf32>
    %63 = vector.broadcast %62 : vector<1x8x1xf32> to vector<4x8x8xf32>
    %64 = arith.mulf %52, %63 : vector<4x8x8xf32>
    %cst_24 = arith.constant dense<0.000000e+00> : vector<4x8x8xf32>
    %65 = tpu.matmul %60, %64, %cst_24 {dimension_numbers = #tpu.dot_dimension_numbers<[2], [1], [1], [2], [0, 0, 0, 1, 1, 2], [0], [0]>} : vector<4x8x8xf32>, vector<4x8x8xf32>, vector<4x8x8xf32> -> vector<4x8x8xf32>
    %cst_25 = arith.constant dense<0.000000e+00> : vector<4x8x8xf32>
    %66 = tpu.matmul %60, %63, %cst_25 {dimension_numbers = #tpu.dot_dimension_numbers<[2], [1], [1], [2], [0, 0, 0, 1, 1, 2], [0], [0]>} : vector<4x8x8xf32>, vector<4x8x8xf32>, vector<4x8x8xf32> -> vector<4x8x8xf32>
    %67 = tpu.reciprocal %66 {approx = true} : vector<4x8x8xf32> -> vector<4x8x8xf32>
    %68 = arith.mulf %65, %67 : vector<4x8x8xf32>
    %c0_26 = arith.constant 0 : index
    %c0_27 = arith.constant 0 : index
    %c0_28 = arith.constant 0 : index
    %c0_29 = arith.constant 0 : index
    %69 = vector.load %arg6[%c0_26, %c0_27, %c0_28, %c0_29] : memref<1x4x8x32xf32, #tpu.memory_space<vmem>>, vector<1x4x8x32xf32>
    %70 = vector.shape_cast %69 : vector<1x4x8x32xf32> to vector<4x8x32xf32>
    %cst_30 = arith.constant dense<0.000000e+00> : vector<4x8x32xf32>
    %71 = tpu.matmul %68, %70, %cst_30 {dimension_numbers = #tpu.dot_dimension_numbers<[2], [1], [1], [2], [0, 0, 0, 1, 1, 2], [0], [0]>} : vector<4x8x8xf32>, vector<4x8x32xf32>, vector<4x8x32xf32> -> vector<4x8x32xf32>
    %cst_31 = arith.constant dense<0.000000e+00> : vector<8x32xf32>
    %72 = vector.multi_reduction <add>, %71, %cst_31 [0] : vector<4x8x32xf32> to vector<8x32xf32>
    %73 = arith.addf %9, %72 : vector<8x32xf32>
    %74 = vector.broadcast %14 : vector<1x32xf32> to vector<8x32xf32>
    %75 = arith.addf %73, %74 : vector<8x32xf32>
    %cst_32 = arith.constant dense<0.000000e+00> : vector<8xf32>
    %76 = vector.multi_reduction <add>, %75, %cst_32 [1] : vector<8x32xf32> to vector<8xf32>
    %77 = vector.shape_cast %76 : vector<8xf32> to vector<8x1xf32>
    %cst_33 = arith.constant 3.200000e+01 : f32
    %78 = vector.broadcast %cst_33 : f32 to vector<8x1xf32>
    %79 = arith.divf %77, %78 : vector<8x1xf32>
    %80 = vector.broadcast %79 : vector<8x1xf32> to vector<8x32xf32>
    %81 = arith.subf %75, %80 : vector<8x32xf32>
    %82 = arith.mulf %81, %81 : vector<8x32xf32>
    %cst_34 = arith.constant dense<0.000000e+00> : vector<8xf32>
    %83 = vector.multi_reduction <add>, %82, %cst_34 [1] : vector<8x32xf32> to vector<8xf32>
    %84 = vector.shape_cast %83 : vector<8xf32> to vector<8x1xf32>
    %cst_35 = arith.constant 3.200000e+01 : f32
    %85 = vector.broadcast %cst_35 : f32 to vector<8x1xf32>
    %86 = arith.divf %84, %85 : vector<8x1xf32>
    %87 = vector.broadcast %79 : vector<8x1xf32> to vector<8x32xf32>
    %88 = arith.subf %75, %87 : vector<8x32xf32>
    %cst_36 = arith.constant 9.99999974E-6 : f32
    %89 = vector.broadcast %cst_36 : f32 to vector<8x1xf32>
    %90 = arith.addf %86, %89 : vector<8x1xf32>
    %91 = math.rsqrt %90 : vector<8x1xf32>
    %92 = vector.broadcast %91 : vector<8x1xf32> to vector<8x32xf32>
    %93 = arith.mulf %88, %92 : vector<8x32xf32>
    %94 = vector.broadcast %15 : vector<1x32xf32> to vector<8x32xf32>
    %95 = arith.mulf %93, %94 : vector<8x32xf32>
    %96 = vector.broadcast %16 : vector<1x32xf32> to vector<8x32xf32>
    %97 = arith.addf %95, %96 : vector<8x32xf32>
    %c0_37 = arith.constant 0 : index
    %c0_38 = arith.constant 0 : index
    %c0_39 = arith.constant 0 : index
    %98 = vector.load %arg8[%c0_37, %c0_38, %c0_39] : memref<1x32x128xf32, #tpu.memory_space<vmem>>, vector<1x32x128xf32>
    %99 = vector.shape_cast %98 : vector<1x32x128xf32> to vector<32x128xf32>
    %cst_40 = arith.constant dense<0.000000e+00> : vector<8x128xf32>
    %100 = tpu.matmul %97, %99, %cst_40 {dimension_numbers = #tpu.dot_dimension_numbers<[1], [0], [0], [1], [0, 0, 1, 1], [], []>} : vector<8x32xf32>, vector<32x128xf32>, vector<8x128xf32> -> vector<8x128xf32>
    %c0_41 = arith.constant 0 : index
    %c0_42 = arith.constant 0 : index
    %c0_43 = arith.constant 0 : index
    %101 = vector.load %arg9[%c0_41, %c0_42, %c0_43] : memref<1x1x128xf32, #tpu.memory_space<vmem>>, vector<1x1x128xf32>
    %102 = vector.shape_cast %101 : vector<1x1x128xf32> to vector<1x128xf32>
    %103 = vector.broadcast %102 : vector<1x128xf32> to vector<8x128xf32>
    %104 = arith.addf %100, %103 : vector<8x128xf32>
    %105 = arith.mulf %104, %104 : vector<8x128xf32>
    %106 = arith.mulf %104, %105 : vector<8x128xf32>
    %cst_44 = arith.constant 4.471500e-02 : f32
    %107 = vector.broadcast %cst_44 : f32 to vector<8x128xf32>
    %108 = arith.mulf %107, %106 : vector<8x128xf32>
    %109 = arith.addf %104, %108 : vector<8x128xf32>
    %cst_45 = arith.constant 0.797884583 : f32
    %110 = vector.broadcast %cst_45 : f32 to vector<8x128xf32>
    %111 = arith.mulf %110, %109 : vector<8x128xf32>
    %112 = math.tanh %111 : vector<8x128xf32>
    %cst_46 = arith.constant 1.000000e+00 : f32
    %113 = vector.broadcast %cst_46 : f32 to vector<8x128xf32>
    %114 = arith.addf %113, %112 : vector<8x128xf32>
    %cst_47 = arith.constant 5.000000e-01 : f32
    %115 = vector.broadcast %cst_47 : f32 to vector<8x128xf32>
    %116 = arith.mulf %115, %114 : vector<8x128xf32>
    %117 = arith.mulf %104, %116 : vector<8x128xf32>
    %c0_48 = arith.constant 0 : index
    %c0_49 = arith.constant 0 : index
    %c0_50 = arith.constant 0 : index
    %118 = vector.load %arg10[%c0_48, %c0_49, %c0_50] : memref<1x128x32xf32, #tpu.memory_space<vmem>>, vector<1x128x32xf32>
    %119 = vector.shape_cast %118 : vector<1x128x32xf32> to vector<128x32xf32>
    %cst_51 = arith.constant dense<0.000000e+00> : vector<8x32xf32>
    %120 = tpu.matmul %117, %119, %cst_51 {dimension_numbers = #tpu.dot_dimension_numbers<[1], [0], [0], [1], [0, 0, 1, 1], [], []>} : vector<8x128xf32>, vector<128x32xf32>, vector<8x32xf32> -> vector<8x32xf32>
    %121 = vector.broadcast %17 : vector<1x32xf32> to vector<8x32xf32>
    %122 = arith.addf %120, %121 : vector<8x32xf32>
    %123 = arith.addf %75, %122 : vector<8x32xf32>
    %c0_52 = arith.constant 0 : index
    %c0_53 = arith.constant 0 : index
    %124 = vector.load %arg12[%c0_52, %c0_53] : memref<8x32xf32, #tpu.memory_space<vmem>>, vector<8x32xf32>
    tpu.vector_store %arg12[%c0_52, %c0_53], %123 {strides = array<i32>} : memref<8x32xf32, #tpu.memory_space<vmem>>, vector<8x32xf32>,
    %c1_i32_54 = arith.constant 1 : i32
    %125 = arith.cmpi eq, %arg1, %c1_i32_54 : i32
    %126 = arith.extui %125 : i1 to i32
    %c0_i32_55 = arith.constant 0 : i32
    %127 = arith.cmpi ne, %126, %c0_i32_55 : i32
    scf.if %127 {
      %c0_56 = arith.constant 0 : index
      %c0_57 = arith.constant 0 : index
      %c0_58 = arith.constant 0 : index
      %128 = vector.load %arg11[%c0_56, %c0_57, %c0_58] : memref<1x8x32xf32, #tpu.memory_space<vmem>>, vector<1x8x32xf32>
      %129 = vector.shape_cast %128 : vector<1x8x32xf32> to vector<8x32xf32>
      %130 = vector.shape_cast %123 : vector<8x32xf32> to vector<1x8x32xf32>
      tpu.vector_store %arg11[%c0_56, %c0_57, %c0_58], %130 {strides = array<i32>} : memref<1x8x32xf32, #tpu.memory_space<vmem>>, vector<1x8x32xf32>,
    } else {
    }
    return
  }
  func.func @transform_0(%arg0: i32, %arg1: i32) -> (i32, i32, i32) {
    %c0_i32 = arith.constant 0 : i32
    %c0_i32_0 = arith.constant 0 : i32
    %c0_i32_1 = arith.constant 0 : i32
    return %arg0, %c0_i32, %c0_i32_0 : i32, i32, i32
  }
  func.func @transform_1(%arg0: i32, %arg1: i32) -> (i32, i32) {
    %c0_i32 = arith.constant 0 : i32
    %c0_i32_0 = arith.constant 0 : i32
    %c0_i32_1 = arith.constant 0 : i32
    return %c0_i32, %c0_i32_0 : i32, i32
  }
  func.func @transform_2(%arg0: i32, %arg1: i32) -> (i32, i32, i32, i32) {
    %c0_i32 = arith.constant 0 : i32
    %c0_i32_0 = arith.constant 0 : i32
    %c0_i32_1 = arith.constant 0 : i32
    %c0_i32_2 = arith.constant 0 : i32
    return %arg1, %c0_i32, %c0_i32_0, %c0_i32_1 : i32, i32, i32, i32
  }
  func.func @transform_3(%arg0: i32, %arg1: i32) -> (i32, i32, i32, i32) {
    %c0_i32 = arith.constant 0 : i32
    %c0_i32_0 = arith.constant 0 : i32
    %c0_i32_1 = arith.constant 0 : i32
    %c0_i32_2 = arith.constant 0 : i32
    return %arg1, %c0_i32, %c0_i32_0, %c0_i32_1 : i32, i32, i32, i32
  }
  func.func @transform_4(%arg0: i32, %arg1: i32) -> (i32, i32, i32, i32) {
    %c0_i32 = arith.constant 0 : i32
    %c0_i32_0 = arith.constant 0 : i32
    %c0_i32_1 = arith.constant 0 : i32
    %c0_i32_2 = arith.constant 0 : i32
    return %arg1, %c0_i32, %c0_i32_0, %c0_i32_1 : i32, i32, i32, i32
  }
  func.func @transform_5(%arg0: i32, %arg1: i32) -> (i32, i32, i32) {
    %c0_i32 = arith.constant 0 : i32
    %c0_i32_0 = arith.constant 0 : i32
    %c0_i32_1 = arith.constant 0 : i32
    return %arg1, %c0_i32, %c0_i32_0 : i32, i32, i32
  }
  func.func @transform_6(%arg0: i32, %arg1: i32) -> (i32, i32, i32) {
    %c0_i32 = arith.constant 0 : i32
    %c0_i32_0 = arith.constant 0 : i32
    %c0_i32_1 = arith.constant 0 : i32
    return %arg1, %c0_i32, %c0_i32_0 : i32, i32, i32
  }
  func.func @transform_7(%arg0: i32, %arg1: i32) -> (i32, i32, i32) {
    %c0_i32 = arith.constant 0 : i32
    %c0_i32_0 = arith.constant 0 : i32
    %c0_i32_1 = arith.constant 0 : i32
    return %arg1, %c0_i32, %c0_i32_0 : i32, i32, i32
  }
  func.func @transform_8(%arg0: i32, %arg1: i32) -> (i32, i32, i32) {
    %c0_i32 = arith.constant 0 : i32
    %c0_i32_0 = arith.constant 0 : i32
    %c0_i32_1 = arith.constant 0 : i32
    return %arg1, %c0_i32, %c0_i32_0 : i32, i32, i32
  }
  func.func @transform_9(%arg0: i32, %arg1: i32) -> (i32, i32, i32) {
    %c0_i32 = arith.constant 0 : i32
    %c0_i32_0 = arith.constant 0 : i32
    %c0_i32_1 = arith.constant 0 : i32
    return %arg0, %c0_i32, %c0_i32_0 : i32, i32, i32
  }
}

</mosaic_0001>

<bundles_post_ra>
// kernel: embedder_forward.1
= control target key start
LH: loop header
LB: loop body
LE: loop exit
PB: predicated region body
PF: predicated region fallthrough
CT: control target
= control target key end

     0   :  { %s4394_s0 = inlined_call_operand.vmem [shape: s32[2,8,1], index: 0, kind: input, shape index: {}]   ;;  %s4395_s1 = inlined_call_operand.vmem [shape: f32[16,32], index: 1, kind: input, shape index: {}]   ;;  %s4396_s2 = inlined_call_operand.vmem [shape: f32[2,12,32,8], index: 2, kind: input, shape index: {}]   ;;  %s4397_s3 = inlined_call_operand.vmem [shape: f32[2,12,1,8], index: 3, kind: input, shape index: {}]   ;;  %s4398_s4 = inlined_call_operand.vmem [shape: f32[2,4,8,32], index: 4, kind: input, shape index: {}]   ;;  %s4399_s5 = inlined_call_operand.vmem [shape: f32[2,8,32], index: 5, kind: input, shape index: {}]   ;;  %s4400_s6 = inlined_call_operand.vmem [shape: f32[2,32,128], index: 6, kind: input, shape index: {}]   ;;  %s4401_s7 = inlined_call_operand.vmem [shape: f32[2,1,128], index: 7, kind: input, shape index: {}]   ;;  %s4402_s8 = inlined_call_operand.vmem [shape: f32[2,128,32], index: 8, kind: input, shape index: {}]   ;;  %s4403_s9 = inlined_call_operand.hbm [shape: f32[2,8,32], index: 9, kind: output, shape index: {}]  }
   0x1   :  { %4413 = sst [smem:[#allocation15_spill]] %s4394_s0 }
   0x2   :  { %4414 = sst [smem:[#allocation16_spill]] %s4396_s2 }
   0x3   :  { %4415 = sst [smem:[#allocation17_spill]] %s4397_s3 }
   0x4   :  { %4416 = sst [smem:[#allocation18_spill]] %s4398_s4 }
   0x5   :  { %14 = vsyncpa [#allocation4], 0 }
   0x6   :  { %16 = vsyncpa [#allocation4 + $0x1], 0  ;;  %s3882_s30 = smov 0   ;;  %s3884_s10 = smov 0  }
   0x7   :  { %s3886_s11 = smov 0   ;;  %s3888_s12 = smov 0  }
   0x8   :  { %s3890_s13 = smov 0   ;;  %s3892_s14 = smov 0  }
   0x9   :  { %s3894_s15 = smov 0   ;;  %s3896_s16 = smov 0  }
   0xa LB: > { %4417 = sst [smem:[#allocation6_spill]] %s3795_s30  ;;  %s3173_s17 = sadd.s32 4294967295, %s3823_s16   ;;  %s3823_s16 = sphi %s3896_s16, %s22_s16   ;;  %s3819_s15 = sphi %s3894_s15, %s4441_s15   ;;  %s3815_s14 = sphi %s3892_s14, %s4440_s14   ;;  %s3811_s13 = sphi %s3890_s13, %s4439_s13   ;;  %s3807_s12 = sphi %s3888_s12, %s4438_s12   ;;  %s3803_s11 = sphi %s3886_s11, %s4437_s11   ;;  %s3799_s10 = sphi %s3884_s10, %s4443_s10   ;;  %s3795_s30 = sphi %s3882_s30, %s4442_s30  }
   0xb   : > { %4418 = sst [smem:[#allocation7_spill]] %s3803_s11  ;;  %s3174_s18 = sadd.s32 4294967294, %s3823_s16  }
   0xc   : > { %4419 = sst [smem:[#allocation8_spill]] %s3815_s14  ;;  %s31_s19 = sadd.s32 1, %s3815_s14 }
   0xd   : > { %4420 = sst [smem:[#allocation9_spill]] %s3819_s15  ;;  %p32_p0 = scmp.ge.s32.totalorder %s31_s19, 2 }
   0xe   : > { %4421 = sst [smem:[#allocation10_spill]] %s3823_s16  ;;  %s34_s20 = sadd.s32 1, %s3819_s15 }
   0xf   : > { %p280_p1 = scmp.ne.s32.totalorder %s3803_s11, %s3799_s10  ;;  %p281_p2 = scmp.eq.s32.totalorder %s3173_s17, 3 }
  0x10   : > { %s4445_s19 = smov (%p32_p0, %s31_s19), 0  ;;  %s4447_s20 = smov (!%p32_p0, %s34_s20), %s3819_s15 }
  0x11   : > { %4422 = sst [smem:[#allocation11_spill]] %s4445_s19  ;;  %p3931_p3 = por %p281_p2, %p280_p1 }
  0x12   : > { %p286_p4 = scmp.ne.s32.totalorder %s3799_s10, %s3795_s30  ;;  %p36_p5 = scmp.ge.s32.totalorder %s4447_s20, 2 }
  0x13   : > { %p287_p6 = scmp.eq.s32.totalorder %s3174_s18, 3  ;;  %p3177_p7 = scmp.ge.s32.totalorder %s3823_s16, 1 }
  0x14   : > { %p367_p8 = scmp.lt.s32.totalorder %s3823_s16, 5  ;;  %s4449_s20 = smov (%p36_p5, %s4447_s20), 0 }
  0x15   : > { %4424 = sst [smem:[#allocation12_spill]] %s4449_s20  ;;  %p3941_p9 = por %p287_p6, %p286_p4 }
  0x16   : > { %p368_p10 = pnand %p3177_p7, %p367_p8  ;;  %s267_s23 = ssub.s32 %s3819_s15, %s4449_s20 }
  0x17   : > { %s4425_s22 = scalar_select %p3941_p9, 1, 0 }
  0x18   : > { %s270_s24 = sadd.s32 1, %s3803_s11  ;;  %p268_p11 = scmp.eq.s32.totalorder %s267_s23, 0 }
  0x19   : > { %4426 = sst [smem:[#allocation13_spill]] %s4425_s22  ;;  %371 = sbr.rel (%p368_p10) target bundleno = 2448 (0x990), region = 56 }
  0x1a   : > { %s3949_s25 = scalar_select %p268_p11, %s3803_s11, %s270_s24  }
  0x1b   : > { %s4405_s26 = sand.u32 (!%p368_p10), 1, %s3799_s10   ;;  %p433_p12 = scmp.lt.s32.totalorder (!%p368_p10), %s3811_s13, 1 }
  0x1c   : > { %4427 = sst [smem:[#allocation14_spill]] %s3949_s25  ;;  %s3955_s27 = sshll.u32 (!%p368_p10), %s4405_s26, 3 }
  0x1d   : > { %p437_p13 = scmp.lt.s32.totalorder (!%p368_p10), %s3807_s12, 1  ;;  %s4428_s0 = sld [smem:[#allocation15_spill]] (!%p368_p10) }
  0x1e   : > { %s434_s28 = scalar_select %p433_p12, %s3811_s13, 1  ;;  %v3825_v1 = vmov 0.0  }
  0x1f   : > { %s3960_s29 = scalar_select %p437_p13, %s3807_s12, 1 }
  0x20   : > { %s3179_s17 = sshll.u32 %s434_s28, 3  ;;  %s4429_s2 = sld [smem:[#allocation16_spill]] }
  0x21   : > { %s3628_s20 = smul.u32 384, %s3960_s29  ;;  %s3243_s26 = sshll.u32 %s3960_s29, 5 }
  0x22   : > { %s3629_s19 = smul.u32 12, %s3960_s29  ;;  %s4430_s4 = sld [smem:[#allocation18_spill]] }
  0x23   : > { %s436_s24 = scalar_lea.vmem %s4428_s0, %s3179_s17  ;;  %s4431_s3 = sld [smem:[#allocation17_spill]] }
  0x24   : > { %v468_v0 = vld [vmem:[%s436_s24] sm:$0xff]  ;;  %s3183_s23 = sshll.u32 %s3960_s29, 3  ;;  %s3995_s22 = scalar_lea.vmem %s4400_s6, %s3243_s26 }
  0x25   : > { %vm469_vm0 = vcmp.ne.s32.totalorder %v468_v0, 1  ;;  %s3990_s15 = scalar_lea.vmem %s4399_s5, %s3183_s23  ;;  %s3245_s28 = sshll.u32 %s3960_s29, 7 }
  0x26   : > { %s3971_s25 = scalar_lea.vmem %s4429_s2, %s3628_s20  ;;  %v3985_v2 = vsel %vm469_vm0, 1.0, %v3825_v1  ;;  %s432_s16 = scalar_lea.vmem [#allocation3], %s3955_s27 }
  0x27   : > { %p3189_p0 = scmp.ne.s32.totalorder %s3807_s12, 0 }
  0x28   : > { %s3976_s30 = scalar_lea.vmem %s4430_s4, %s3243_s26  ;;  %s4005_s4 = scalar_lea.vmem %s4402_s8, %s3245_s28 }
  0x29   : > { %s3981_s17 = scalar_lea.vmem %s4431_s3, %s3629_s19  ;;  %s462_s19 = scalar_lea.vmem %s4401_s7, %s3960_s29 }
  0x2a   : > { %475 = sbr.rel (%p3189_p0) target bundleno = 370 (0x172), region = 60 }
  0x2f   : > { %v485_v3 = vld [vmem:[%s4395_s1 + $0x8] sm:$0xff]  ;;  %v3826_v4 = vmov 0   ;;  %v3827_v5 = vmov 0.0   ;;  %v484_v6 = vld [vmem:[%s4395_s1] sm:$0xff]  ;;  %vm3828_vm1 = vmmov 0   ;;  %v476_v7 = vlaneseq }
  0x30   : > { %3707 = vset.pattern.permute.xlu0 %v3826_v4  ;;  %3363 = vmatprep.subr.mxu0 %v3827_v5  ;;  %vm486_vm2 = vcmask 130048   ;;  %vm560_vm4 = vcmask 261120  }
  0x31   : > { %479 = vperm.xlu0 %3707, %v468_v0   ;;  %3364 = vmatpush3.msra.mxu0 %v485_v3  ;;  %v477_v8 = vand.u32 127, %v476_v7 }
  0x32   : > { %3365 = vmatprep.subr.mxu0 %v3827_v5  ;;  %3367 = vmatprep.mubr.msk.f32.mxu0 %vm3828_vm1, %v3827_v5 }
  0x33   : > { %3366 = vmatpush3.msra.mxu0 %v484_v6 }
  0xac   : > { %v480_v9 = vpop.permute.xlu0 %479 }
  0xad   : > { %vm481_vm3 = vcmp.eq.s32.totalorder %v480_v9, %v477_v8 }
  0xae   : > { %v3190_v10 = vsel %vm481_vm3, 1.0, %v3827_v5 }
  0xaf   : > { %3368 = vmatmul.mubr.msk.f32.vlgmr.msra.gmra.mxu0 %vm486_vm2, %v3190_v10 }
 0x16f   : > { %v556_v11 = vpop.f32.mrf.mxu0 }
 0x170   : > { %561 = vst.msk [vmem:[#allocation2] sm:$0xff] %vm560_vm4, %v556_v11 }
 0x171   : > { %v3369_v12 = vpop.f32.mrf.mxu0 }
 0x172 PF: > { %vm564_vm5 = vcmask 261120   ;;  %3370 = vmatprep.subr.mxu0 %v3825_v1  ;;  %3403 = vmatprep.subr.mxu1 %v3825_v1  ;;  %v592_v20 = vld [vmem:[%s3971_s25 + $0x18] sm:$0xff]  ;;  %v591_v22 = vld [vmem:[%s3971_s25 + $0x10] sm:$0xff]  ;;  %v590_v24 = vld [vmem:[%s3971_s25 + $0x8] sm:$0xff]  ;;  %vm3829_vm6 = vmmov 0   ;;  %v579_v31 = vlaneseq  ;;  %vm1564_vm7 = vcmask 64512  }
 0x173   : > { %v604_v21 = vld [vmem:[%s3971_s25 + $0x78] sm:$0xff]  ;;  %3371 = vmatpush3.msra.mxu0 %v592_v20  ;;  %v603_v23 = vld [vmem:[%s3971_s25 + $0x70] sm:$0xff]  ;;  %v602_v25 = vld [vmem:[%s3971_s25 + $0x68] sm:$0xff]  ;;  %3378 = vmatprep.mubr.msk.f32.mxu0 %vm3829_vm6, %v3825_v1  ;;  %p3238_p1 = scmp.ne.s32.totalorder %s3807_s12, 1 }
 0x174   : > { %3404 = vmatpush3.msra.mxu1 %v604_v21  ;;  %3372 = vmatprep.subr.mxu0 %v3825_v1  ;;  %v589_v26 = vld [vmem:[%s3971_s25] sm:$0xff]  ;;  %v4043_v32 = vshrl.u32 %v579_v31, 7  ;;  %v596_v42 = vld [vmem:[%s3971_s25 + $0x38] sm:$0xff]  ;;  %v595_v44 = vld [vmem:[%s3971_s25 + $0x30] sm:$0xff] }
 0x175   : > { %3405 = vmatprep.subr.mxu1 %v3825_v1  ;;  %3373 = vmatpush3.msra.mxu0 %v591_v22  ;;  %v601_v27 = vld [vmem:[%s3971_s25 + $0x60] sm:$0xff]  ;;  %v612_v43 = vld [vmem:[%s3971_s25 + $0xb8] sm:$0xff]  ;;  %v611_v45 = vld [vmem:[%s3971_s25 + $0xb0] sm:$0xff] }
 0x176   : > { %3406 = vmatpush3.msra.mxu1 %v603_v23  ;;  %3374 = vmatprep.subr.mxu0 %v3825_v1  ;;  %v581_v33 = vsub.s32 0, %v4043_v32  ;;  %v4047_v34 = vld [vmem:[%s3990_s15] sm:$0xff]  ;;  %v586_v35 = vsub.s32 1, %v4043_v32  ;;  %v594_v46 = vld [vmem:[%s3971_s25 + $0x28] sm:$0xff]  ;;  %v600_v50 = vld [vmem:[%s3971_s25 + $0x58] sm:$0xff] }
 0x177   : > { %v4015_v13 = vld [vmem:[#allocation2] sm:$0xff]  ;;  %3407 = vmatprep.subr.mxu1 %v3825_v1  ;;  %3375 = vmatpush3.msra.mxu0 %v590_v24  ;;  %v610_v47 = vld [vmem:[%s3971_s25 + $0xa8] sm:$0xff]  ;;  %v620_v51 = vld [vmem:[%s3971_s25 + $0xf8] sm:$0xff] }
 0x178   : > { %v565_v14 = vsel %vm564_vm5, %v4015_v13, 0.0  ;;  %3408 = vmatpush3.msra.mxu1 %v602_v25  ;;  %3376 = vmatprep.subr.mxu0 %v3825_v1  ;;  %v582_v36 = vrot.slane %v4047_v34, %v581_v33  ;;  %v587_v38 = vrot.slane %v4047_v34, %v586_v35  ;;  %v593_v48 = vld [vmem:[%s3971_s25 + $0x20] sm:$0xff]  ;;  %v599_v52 = vld [vmem:[%s3971_s25 + $0x50] sm:$0xff]  ;;  %v598_v54 = vld [vmem:[%s3971_s25 + $0x48] sm:$0xff] }
 0x179   : > { %566 = vadd.xlane.f32.xlu0 %v565_v14  ;;  %3409 = vmatprep.subr.mxu1 %v3825_v1  ;;  %v609_v49 = vld [vmem:[%s3971_s25 + $0xa0] sm:$0xff]  ;;  %v619_v53 = vld [vmem:[%s3971_s25 + $0xf0] sm:$0xff]  ;;  %v618_v55 = vld [vmem:[%s3971_s25 + $0xe8] sm:$0xff] }
 0x17a   : > { %3377 = vmatpush3.msra.mxu0 %v589_v26  ;;  %3410 = vmatpush3.msra.mxu1 %v601_v27  ;;  %v597_v56 = vld [vmem:[%s3971_s25 + $0x40] sm:$0xff]  ;;  %v608_v58 = vld [vmem:[%s3971_s25 + $0x98] sm:$0xff]  ;;  %v607_v60 = vld [vmem:[%s3971_s25 + $0x90] sm:$0xff] }
 0x17b   : > { %3381 = vmatprep.subr.mxu0 %v3825_v1  ;;  %3411 = vmatprep.mubr.msk.f32.mxu1 %vm3829_vm6, %v3825_v1  ;;  %v617_v57 = vld [vmem:[%s3971_s25 + $0xe0] sm:$0xff]  ;;  %v628_v59 = vld [vmem:[%s3971_s25 + $0x138] sm:$0xff]  ;;  %v627_v61 = vld [vmem:[%s3971_s25 + $0x130] sm:$0xff] }
 0x17c   : > { %3425 = vmatprep.subr.mxu1 %v3825_v1  ;;  %v606_v62 = vld [vmem:[%s3971_s25 + $0x88] sm:$0xff]  ;;  %v605_v0 = vld [vmem:[%s3971_s25 + $0x80] sm:$0xff]  ;;  %v616_v4 = vld [vmem:[%s3971_s25 + $0xd8] sm:$0xff] }
 0x17d   : > { %v626_v63 = vld [vmem:[%s3971_s25 + $0x128] sm:$0xff]  ;;  %v625_v3 = vld [vmem:[%s3971_s25 + $0x120] sm:$0xff]  ;;  %v636_v5 = vld [vmem:[%s3971_s25 + $0x178] sm:$0xff] }
 0x17e   : > { %v615_v6 = vld [vmem:[%s3971_s25 + $0xd0] sm:$0xff]  ;;  %v614_v8 = vld [vmem:[%s3971_s25 + $0xc8] sm:$0xff]  ;;  %v613_v10 = vld [vmem:[%s3971_s25 + $0xc0] sm:$0xff] }
 0x17f   : > { %v635_v7 = vld [vmem:[%s3971_s25 + $0x170] sm:$0xff]  ;;  %v634_v9 = vld [vmem:[%s3971_s25 + $0x168] sm:$0xff]  ;;  %v633_v11 = vld [vmem:[%s3971_s25 + $0x160] sm:$0xff] }
 0x180   : > { %v624_v12 = vld [vmem:[%s3971_s25 + $0x118] sm:$0xff]  ;;  %v623_v14 = vld [vmem:[%s3971_s25 + $0x110] sm:$0xff]  ;;  %v629_v20 = vld [vmem:[%s3971_s25 + $0x140] sm:$0xff] }
 0x181   : > { %v3195_v33 = vld [vmem:[%s3981_s17 + $0x3] ss:$0 sm:$0xff] }
 0x202   : > { %v567_v15 = vpop.xlane.xlu0 %566 }
 0x203   : > { %v569_v16 = vmul.f32 0.03125, %v567_v15  ;;  %v622_v15 = vld [vmem:[%s3971_s25 + $0x108] sm:$0xff] }
 0x205   : > { %v570_v17 = vsub.f32 %v4015_v13, %v569_v16  ;;  %v621_v16 = vld [vmem:[%s3971_s25 + $0x100] sm:$0xff] }
 0x207   : > { %v571_v18 = vmul.f32 %v570_v17, %v570_v17 }
 0x209   : > { %v572_v19 = vsel %vm564_vm5, %v571_v18, 0.0  ;;  %v631_v18 = vld [vmem:[%s3971_s25 + $0x150] sm:$0xff] }
 0x20a   : > { %573 = vadd.xlane.f32.xlu0 %v572_v19  ;;  %v630_v19 = vld [vmem:[%s3971_s25 + $0x148] sm:$0xff] }
 0x293   : > { %v574_v28 = vpop.xlane.xlu0 %573 }
 0x294   : > { %v575_v29 = vmul.f32 0.03125, %v574_v28 }
 0x296   : > { %v576_v30 = vadd.f32 1e-05, %v575_v29  ;;  %v3199_v29 = vld [vmem:[%s3981_s17 + $0x7] ss:$0 sm:$0xff] }
 0x298   : > { %3709 = vrsqrt.f32 %v576_v30 }
 0x2a5   : > { %v3710_v37 = vpop.eup %3709 }
 0x2a6   : > { %v578_v39 = vmul.f32 %v3710_v37, %v570_v17  ;;  %v632_v17 = vld [vmem:[%s3971_s25 + $0x158] sm:$0xff] }
 0x2a8   : > { %v583_v40 = vmul.f32 %v582_v36, %v578_v39  ;;  %v3196_v39 = vld [vmem:[%s3981_s17 + $0x4] ss:$0 sm:$0xff] }
 0x2aa   : > { %v4052_v41 = vadd.f32 %v587_v38, %v583_v40 }
 0x2ac   : > { %3379 = vmatmul.mubr.msk.f32.vlgmr.msra.gmra.mxu0 %vm564_vm5, %v4052_v41  ;;  %3412 = vmatmul.mubr.msk.f32.vlgmr.msra.gmra.mxu1 %vm564_vm5, %v4052_v41 }
 0x2ad   : > { %3382 = vmatpush3.msra.mxu0 %v596_v42  ;;  %3426 = vmatpush3.msra.mxu1 %v612_v43 }
 0x2ae   : > { %3383 = vmatprep.subr.mxu0 %v3825_v1  ;;  %3427 = vmatprep.subr.mxu1 %v3825_v1 }
 0x2af   : > { %3384 = vmatpush3.msra.mxu0 %v595_v44  ;;  %3428 = vmatpush3.msra.mxu1 %v611_v45  ;;  %v3197_v44 = vld [vmem:[%s3981_s17 + $0x5] ss:$0 sm:$0xff] }
 0x2b0   : > { %3385 = vmatprep.subr.mxu0 %v3825_v1  ;;  %3429 = vmatprep.subr.mxu1 %v3825_v1 }
 0x2b1   : > { %3386 = vmatpush3.msra.mxu0 %v594_v46  ;;  %3430 = vmatpush3.msra.mxu1 %v610_v47 }
 0x2b2   : > { %3387 = vmatprep.subr.mxu0 %v3825_v1  ;;  %3431 = vmatprep.subr.mxu1 %v3825_v1 }
 0x2b3   : > { %3388 = vmatpush3.msra.mxu0 %v593_v48  ;;  %3389 = vmatprep.mubr.msk.f32.mxu0 %vm3829_vm6, %v3825_v1  ;;  %v3193_v48 = vld [vmem:[%s3981_s17 + $0x1] ss:$0 sm:$0xff] }
 0x2b4   : > { %3432 = vmatpush3.msra.mxu1 %v609_v49  ;;  %3433 = vmatprep.mubr.msk.f32.mxu1 %vm3829_vm6, %v3825_v1 }
 0x2b5   : > { %3390 = vmatmul.mubr.msk.f32.vlgmr.msra.gmra.mxu0 %vm564_vm5, %v4052_v41  ;;  %3392 = vmatprep.subr.mxu0 %v3825_v1 }
 0x2b6   : > { %3434 = vmatmul.mubr.msk.f32.vlgmr.msra.gmra.mxu1 %vm564_vm5, %v4052_v41  ;;  %3447 = vmatprep.subr.mxu1 %v3825_v1 }
 0x2b7   : > { %3393 = vmatpush3.msra.mxu0 %v600_v50  ;;  %3448 = vmatpush3.msra.mxu1 %v620_v51  ;;  %v3198_v51 = vld [vmem:[%s3981_s17 + $0x6] ss:$0 sm:$0xff] }
 0x2b8   : > { %3394 = vmatprep.subr.mxu0 %v3825_v1  ;;  %3449 = vmatprep.subr.mxu1 %v3825_v1 }
 0x2b9   : > { %3395 = vmatpush3.msra.mxu0 %v599_v52  ;;  %3450 = vmatpush3.msra.mxu1 %v619_v53  ;;  %v3194_v53 = vld [vmem:[%s3981_s17 + $0x2] ss:$0 sm:$0xff] }
 0x2ba   : > { %3396 = vmatprep.subr.mxu0 %v3825_v1  ;;  %3451 = vmatprep.subr.mxu1 %v3825_v1 }
 0x2bb   : > { %3397 = vmatpush3.msra.mxu0 %v598_v54  ;;  %3452 = vmatpush3.msra.mxu1 %v618_v55 }
 0x2bc   : > { %3398 = vmatprep.subr.mxu0 %v3825_v1  ;;  %3453 = vmatprep.subr.mxu1 %v3825_v1 }
 0x2bd   : > { %3399 = vmatpush3.msra.mxu0 %v597_v56  ;;  %3400 = vmatprep.mubr.msk.f32.mxu0 %vm3829_vm6, %v3825_v1 }
 0x2be   : > { %3454 = vmatpush3.msra.mxu1 %v617_v57  ;;  %3455 = vmatprep.mubr.msk.f32.mxu1 %vm3829_vm6, %v3825_v1 }
 0x2bf   : > { %3401 = vmatmul.mubr.msk.f32.vlgmr.msra.gmra.mxu0 %vm564_vm5, %v4052_v41  ;;  %3414 = vmatprep.subr.mxu0 %v3825_v1 }
 0x2c0   : > { %3456 = vmatmul.mubr.msk.f32.vlgmr.msra.gmra.mxu1 %vm564_vm5, %v4052_v41  ;;  %3469 = vmatprep.subr.mxu1 %v3825_v1 }
 0x2c1   : > { %3415 = vmatpush3.msra.mxu0 %v608_v58  ;;  %3470 = vmatpush3.msra.mxu1 %v628_v59 }
 0x2c2   : > { %3416 = vmatprep.subr.mxu0 %v3825_v1  ;;  %3471 = vmatprep.subr.mxu1 %v3825_v1 }
 0x2c3   : > { %3417 = vmatpush3.msra.mxu0 %v607_v60  ;;  %3472 = vmatpush3.msra.mxu1 %v627_v61 }
 0x2c4   : > { %3418 = vmatprep.subr.mxu0 %v3825_v1  ;;  %3473 = vmatprep.subr.mxu1 %v3825_v1 }
 0x2c5   : > { %3419 = vmatpush3.msra.mxu0 %v606_v62  ;;  %3474 = vmatpush3.msra.mxu1 %v626_v63  ;;  %v3830_v63 = vmov 0  }
 0x2c6   : > { %3420 = vmatprep.subr.mxu0 %v3825_v1  ;;  %3475 = vmatprep.subr.mxu1 %v3825_v1 }
 0x2c7   : > { %3421 = vmatpush3.msra.mxu0 %v605_v0  ;;  %3422 = vmatprep.mubr.msk.f32.mxu0 %vm3829_vm6, %v3825_v1 }
 0x2c8   : > { %3476 = vmatpush3.msra.mxu1 %v625_v3  ;;  %3477 = vmatprep.mubr.msk.f32.mxu1 %vm3829_vm6, %v3825_v1 }
 0x2c9   : > { %3423 = vmatmul.mubr.msk.f32.vlgmr.msra.gmra.mxu0 %vm564_vm5, %v4052_v41  ;;  %3436 = vmatprep.subr.mxu0 %v3825_v1 }
 0x2ca   : > { %3478 = vmatmul.mubr.msk.f32.vlgmr.msra.gmra.mxu1 %vm564_vm5, %v4052_v41  ;;  %3491 = vmatprep.subr.mxu1 %v3825_v1 }
 0x2cb   : > { %3437 = vmatpush3.msra.mxu0 %v616_v4  ;;  %3492 = vmatpush3.msra.mxu1 %v636_v5 }
 0x2cc   : > { %3438 = vmatprep.subr.mxu0 %v3825_v1  ;;  %3493 = vmatprep.subr.mxu1 %v3825_v1 }
 0x2cd   : > { %3439 = vmatpush3.msra.mxu0 %v615_v6  ;;  %3494 = vmatpush3.msra.mxu1 %v635_v7 }
 0x2ce   : > { %3440 = vmatprep.subr.mxu0 %v3825_v1  ;;  %3495 = vmatprep.subr.mxu1 %v3825_v1 }
 0x2cf   : > { %3441 = vmatpush3.msra.mxu0 %v614_v8  ;;  %3496 = vmatpush3.msra.mxu1 %v634_v9 }
 0x2d0   : > { %3442 = vmatprep.subr.mxu0 %v3825_v1  ;;  %3497 = vmatprep.subr.mxu1 %v3825_v1 }
 0x2d1   : > { %3443 = vmatpush3.msra.mxu0 %v613_v10  ;;  %3444 = vmatprep.mubr.msk.f32.mxu0 %vm3829_vm6, %v3825_v1 }
 0x2d2   : > { %3498 = vmatpush3.msra.mxu1 %v633_v11  ;;  %3499 = vmatprep.mubr.msk.f32.mxu1 %vm3829_vm6, %v3825_v1 }
 0x2d3   : > { %3445 = vmatmul.mubr.msk.f32.vlgmr.msra.gmra.mxu0 %vm564_vm5, %v4052_v41  ;;  %3458 = vmatprep.subr.mxu0 %v3825_v1 }
 0x2d4   : > { %3500 = vmatmul.mubr.msk.f32.vlgmr.msra.gmra.mxu1 %vm564_vm5, %v4052_v41  ;;  %3459 = vmatpush3.msra.mxu0 %v624_v12 }
 0x2d5   : > { %3460 = vmatprep.subr.mxu0 %v3825_v1  ;;  %3466 = vmatprep.mubr.msk.f32.mxu0 %vm3829_vm6, %v3825_v1 }
 0x2d6   : > { %3461 = vmatpush3.msra.mxu0 %v623_v14  ;;  %3517 = vmatprep.subr.mxu1 %v3825_v1 }
 0x2d7   : > { %3462 = vmatprep.subr.mxu0 %v3825_v1  ;;  %3519 = vmatprep.mubr.msk.f32.mxu1 %vm3829_vm6, %v3825_v1 }
 0x2d8   : > { %3463 = vmatpush3.msra.mxu0 %v622_v15  ;;  %3708 = vset.pattern.permute.xlu0 %v3830_v63 }
 0x2d9   : > { %3464 = vmatprep.subr.mxu0 %v3825_v1 }
 0x2da   : > { %3465 = vmatpush3.msra.mxu0 %v621_v16 }
 0x2db   : > { %3467 = vmatmul.mubr.msk.f32.vlgmr.msra.gmra.mxu0 %vm564_vm5, %v4052_v41  ;;  %3480 = vmatprep.subr.mxu0 %v3825_v1 }
 0x2dc   : > { %3481 = vmatpush3.msra.mxu0 %v632_v17  ;;  %3488 = vmatprep.mubr.msk.f32.mxu0 %vm3829_vm6, %v3825_v1 }
 0x2dd   : > { %3482 = vmatprep.subr.mxu0 %v3825_v1 }
 0x2de   : > { %3483 = vmatpush3.msra.mxu0 %v631_v18 }
 0x2df   : > { %3484 = vmatprep.subr.mxu0 %v3825_v1 }
 0x2e0   : > { %3485 = vmatpush3.msra.mxu0 %v630_v19 }
 0x2e1   : > { %3486 = vmatprep.subr.mxu0 %v3825_v1 }
 0x2e2   : > { %3487 = vmatpush3.msra.mxu0 %v629_v20 }
 0x2e3   : > { %3489 = vmatmul.mubr.msk.f32.vlgmr.msra.gmra.mxu0 %vm564_vm5, %v4052_v41  ;;  %3502 = vmatprep.subr.mxu0 %v3825_v1  ;;  %v3192_v41 = vld [vmem:[%s3981_s17] ss:$0 sm:$0xff] }
 0x2e4   : > { %3504 = vmatprep.mubr.msk.f32.mxu0 %vm3829_vm6, %v3825_v1 }
 0x36c   : > { %v790_v21 = vpop.f32.mrf.mxu0  ;;  %v1000_v22 = vpop.f32.mrf.mxu1 }
 0x36d   : > { %v1001_v38 = vadd.f32 %v3195_v33, %v1000_v22  ;;  %v791_v47 = vadd.f32 %v3192_v41, %v790_v21  ;;  %v3202_v33 = vld [vmem:[%s3981_s17 + $0xa] ss:$0 sm:$0xff] }
 0x36e   : > { %v3380_v23 = vpop.f32.mrf.mxu0  ;;  %v3413_v24 = vpop.f32.mrf.mxu1 }
 0x375   : > { %v860_v25 = vpop.f32.mrf.mxu0 }
 0x376   : > { %v1140_v26 = vpop.f32.mrf.mxu1  ;;  %v861_v50 = vadd.f32 %v3193_v48, %v860_v25 }
 0x377   : > { %v3391_v27 = vpop.f32.mrf.mxu0  ;;  %v1141_v49 = vadd.f32 %v3197_v44, %v1140_v26 }
 0x378   : > { %v3435_v28 = vpop.f32.mrf.mxu1 }
 0x37f   : > { %v930_v30 = vpop.f32.mrf.mxu0 }
 0x380   : > { %v1280_v31 = vpop.f32.mrf.mxu1  ;;  %v931_v58 = vadd.f32 %v3194_v53, %v930_v30 }
 0x381   : > { %v1281_v35 = vadd.f32 %v3199_v29, %v1280_v31  ;;  %v3402_v36 = vpop.f32.mrf.mxu0  ;;  %v3200_v31 = vld [vmem:[%s3981_s17 + $0x8] ss:$0 sm:$0xff] }
 0x382   : > { %v3457_v37 = vpop.f32.mrf.mxu1 }
 0x383   : > { %3518 = vmatpush3.xpose.msk.msra.mxu1 %vm1564_vm7, %v1281_v35  ;;  %v3203_v37 = vld [vmem:[%s3981_s17 + $0xb] ss:$0 sm:$0xff] }
 0x384   : > { %3527 = vmatprep.subr.mxu1 %v3825_v1 }
 0x386   : > { %3520 = vmatmul.mubr.msk.f32.vlgmr.msra.gmra.mxu1 %vm1564_vm7, %v1001_v38 }
 0x387   : > { %3529 = vmatprep.mubr.msk.f32.mxu1 %vm3829_vm6, %v3825_v1 }
 0x389   : > { %v1070_v40 = vpop.f32.mrf.mxu0 }
 0x38a   : > { %v1071_v42 = vadd.f32 %v3196_v39, %v1070_v40  ;;  %v4191_v43 = vpop.f32.mrf.mxu1 }
 0x38b   : > { %v3424_v45 = vpop.f32.mrf.mxu0 }
 0x38c   : > { %v3479_v46 = vpop.f32.mrf.mxu1  ;;  %3503 = vmatpush3.xpose.msk.msra.mxu0 %vm1564_vm7, %v1071_v42 }
 0x38d   : > { %3507 = vmatprep.subr.mxu0 %v3825_v1 }
 0x38f   : > { %3505 = vmatmul.mubr.msk.f32.vlgmr.msra.gmra.mxu0 %vm1564_vm7, %v791_v47 }
 0x390   : > { %3508 = vmatpush3.xpose.msk.msra.mxu0 %vm1564_vm7, %v1141_v49  ;;  %3509 = vmatprep.mubr.msk.f32.mxu0 %vm3829_vm6, %v3825_v1  ;;  %v2486_v49 = vld [vmem:[%s3976_s30] sm:$0xff] }
 0x391   : > { %3512 = vmatprep.subr.mxu0 %v3825_v1 }
 0x393   : > { %v1210_v52 = vpop.f32.mrf.mxu0  ;;  %3510 = vmatmul.mubr.msk.f32.vlgmr.msra.gmra.mxu0 %vm1564_vm7, %v861_v50  ;;  %v2487_v50 = vld [vmem:[%s3976_s30 + $0x8] sm:$0xff] }
 0x394   : > { %v1211_v54 = vadd.f32 %v3198_v51, %v1210_v52  ;;  %v4205_v55 = vpop.f32.mrf.mxu1  ;;  %3514 = vmatprep.mubr.msk.f32.mxu0 %vm3829_vm6, %v3825_v1 }
 0x395   : > { %v3446_v56 = vpop.f32.mrf.mxu0  ;;  %v1561_v44 = vadd.f32 %v3203_v37, %v4205_v55 }
 0x396   : > { %v3501_v57 = vpop.f32.mrf.mxu1  ;;  %3513 = vmatpush3.xpose.msk.msra.mxu0 %vm1564_vm7, %v1211_v54 }
 0x397   : > { %3522 = vmatprep.subr.mxu0 %v3825_v1 }
 0x399   : > { %3515 = vmatmul.mubr.msk.f32.vlgmr.msra.gmra.mxu0 %vm1564_vm7, %v931_v58 }
 0x39a   : > { %3524 = vmatprep.mubr.msk.f32.mxu0 %vm3829_vm6, %v3825_v1 }
 0x39b   : > { %v1350_v59 = vpop.f32.mrf.mxu0 }
 0x39c   : > { %v1351_v36 = vadd.f32 %v3200_v31, %v1350_v59 }
 0x39d   : > { %v3468_v60 = vpop.f32.mrf.mxu0 }
 0x3a3   : > { %v1490_v61 = vpop.f32.mrf.mxu0 }
 0x3a4   : > { %v1491_v40 = vadd.f32 %v3202_v33, %v1490_v61 }
 0x3a5   : > { %v3490_v62 = vpop.f32.mrf.mxu0 }
 0x446   : > { %v1865_v0 = vpop.f32.mrf.mxu1 }
 0x447   : > { %v1872_v11 = vmul.f32 0.35355338, %v1865_v0 }
 0x448   : > { %v3521_v3 = vpop.f32.mrf.mxu1 }
 0x449   : > { %v1882_v16 = vsel %vm1564_vm7, %v1872_v11, -inf }
 0x44f   : > { %v1637_v4 = vpop.f32.mrf.mxu0 }
 0x450   : > { %v1869_v5 = vmul.f32 0.35355338, %v1637_v4 }
 0x451   : > { %v3506_v6 = vpop.f32.mrf.mxu0 }
 0x452   : > { %v1873_v7 = vsel %vm1564_vm7, %v1869_v5, -inf }
 0x453   : > { %1874 = vmax.xlane.f32.xlu1 %v1873_v7  ;;  %v1713_v8 = vpop.f32.mrf.mxu0 }
 0x454   : > { %v1870_v9 = vmul.f32 0.35355338, %v1713_v8  ;;  %v2489_v8 = vld [vmem:[%s3976_s30 + $0x18] sm:$0xff] }
 0x455   : > { %v3511_v10 = vpop.f32.mrf.mxu0 }
 0x456   : > { %v1876_v12 = vsel %vm1564_vm7, %v1870_v9, -inf  ;;  %v2488_v10 = vld [vmem:[%s3976_s30 + $0x10] sm:$0xff] }
 0x457   : > { %1877 = vmax.xlane.f32.xlu1 %v1876_v12 }
 0x459   : > { %v1789_v14 = vpop.f32.mrf.mxu0 }
 0x45a   : > { %v1871_v15 = vmul.f32 0.35355338, %v1789_v14 }
 0x45b   : > { %v3516_v17 = vpop.f32.mrf.mxu0  ;;  %1883 = vmax.xlane.f32.xlu1 %v1882_v16 }
 0x45c   : > { %v1879_v18 = vsel %vm1564_vm7, %v1871_v15, -inf }
 0x45d   : > { %1880 = vmax.xlane.f32.xlu0 %v1879_v18 }
 0x473   : > { %1899 = vperm.xlu0 %3708, %v3985_v2   ;;  %v3201_v2 = vld [vmem:[%s3981_s17 + $0x9] ss:$0 sm:$0xff] }
 0x474   : > { %v1421_v35 = vadd.f32 %v3201_v2, %v4191_v43 }
 0x4dc   : > { %v1875_v19 = vpop.xlane.xlu1 %1874 }
 0x4dd   : > { %v1885_v20 = vsub.f32 %v1869_v5, %v1875_v19 }
 0x4df   : > { %v1889_v21 = vmul.f32 1.442695, %v1885_v20 }
 0x4e0   : > { %v1878_v22 = vpop.xlane.xlu1 %1877 }
 0x4e1   : > { %v1886_v23 = vsub.f32 %v1870_v9, %v1878_v22  ;;  %3711 = vpow2.f32 %v1889_v21 }
 0x4e3   : > { %v1891_v24 = vmul.f32 1.442695, %v1886_v23 }
 0x4e4   : > { %v1884_v25 = vpop.xlane.xlu1 %1883 }
 0x4e5   : > { %3713 = vpow2.f32 %v1891_v24  ;;  %v1888_v26 = vsub.f32 %v1872_v11, %v1884_v25  ;;  %v2792_v25 = vsub.s32 2, %v4043_v32 }
 0x4e6   : > { %v1881_v27 = vpop.xlane.xlu0 %1880 }
 0x4e7   : > { %v1895_v28 = vmul.f32 1.442695, %v1888_v26  ;;  %v1887_v29 = vsub.f32 %v1871_v15, %v1881_v27  ;;  %v2793_v31 = vrot.slane %v4047_v34, %v2792_v25 }
 0x4e9   : > { %3715 = vpow2.f32 %v1895_v28  ;;  %v1893_v30 = vmul.f32 1.442695, %v1887_v29 }
 0x4eb   : > { %3717 = vpow2.f32 %v1893_v30 }
 0x4ee   : > { %v1900_v38 = vpop.permute.xlu0 %1899  ;;  %v3712_v39 = vpop.eup %3711 }
 0x4ef   : > { %v1902_v41 = vmul.f32 %v1900_v38, %v1351_v36  ;;  %v1903_v42 = vmul.f32 %v1900_v38, %v1421_v35  ;;  %v1904_v45 = vmul.f32 %v1900_v38, %v1491_v40  ;;  %v1905_v43 = vmul.f32 %v1900_v38, %v1561_v44  ;;  %v2820_v44 = vld [vmem:[%s3995_s22 + $0x10] sm:$0xff] }
 0x4f1   : > { %3523 = vmatpush3.msra.mxu0 %v1902_v41  ;;  %3528 = vmatpush3.msra.mxu1 %v1903_v42  ;;  %v2821_v42 = vld [vmem:[%s3995_s22 + $0x18] sm:$0xff] }
 0x4f2   : > { %v3714_v46 = vpop.eup %3713  ;;  %3525 = vmatmul.mubr.msk.f32.vlgmr.msra.gmra.mxu0 %vm1564_vm7, %v3712_v39  ;;  %3532 = vmatprep.subr.mxu0 %v3825_v1 }
 0x4f3   : > { %3533 = vmatpush3.msra.mxu0 %v1904_v45  ;;  %3537 = vmatprep.subr.mxu1 %v3825_v1  ;;  %v2818_v45 = vld [vmem:[%s3995_s22] sm:$0xff] }
 0x4f4   : > { %3530 = vmatmul.mubr.msk.f32.vlgmr.msra.gmra.mxu1 %vm1564_vm7, %v3714_v46  ;;  %3534 = vmatprep.mubr.msk.f32.mxu0 %vm3829_vm6, %v3825_v1 }
 0x4f5   : > { %3538 = vmatpush3.msra.mxu1 %v1905_v43  ;;  %3539 = vmatprep.mubr.msk.f32.mxu1 %vm3829_vm6, %v3825_v1 }
 0x4f6   : > { %v3716_v47 = vpop.eup %3715  ;;  %3542 = vmatprep.subr.mxu0 %v3825_v1  ;;  %3547 = vmatprep.subr.mxu1 %v3825_v1 }
 0x4f8   : > { %v3718_v48 = vpop.eup %3717  ;;  %3540 = vmatmul.mubr.msk.f32.vlgmr.msra.gmra.mxu1 %vm1564_vm7, %v3716_v47 }
 0x4f9   : > { %3535 = vmatmul.mubr.msk.f32.vlgmr.msra.gmra.mxu0 %vm1564_vm7, %v3718_v48  ;;  %3548 = vmatpush3.msra.mxu1 %v1900_v38 }
 0x4fa   : > { %3543 = vmatpush3.msra.mxu0 %v1900_v38  ;;  %3544 = vmatprep.mubr.msk.f32.mxu0 %vm3829_vm6, %v3825_v1 }
 0x4fb   : > { %3549 = vmatprep.mubr.msk.f32.mxu1 %vm3829_vm6, %v3825_v1  ;;  %3552 = vmatprep.subr.mxu0 %v3825_v1 }
 0x4fc   : > { %3557 = vmatprep.subr.mxu1 %v3825_v1  ;;  %3550 = vmatmul.mubr.msk.f32.vlgmr.msra.gmra.mxu1 %vm1564_vm7, %v3714_v46 }
 0x4fd   : > { %3545 = vmatmul.mubr.msk.f32.vlgmr.msra.gmra.mxu0 %vm1564_vm7, %v3712_v39  ;;  %3558 = vmatpush3.msra.mxu1 %v1900_v38 }
 0x4fe   : > { %3553 = vmatpush3.msra.mxu0 %v1900_v38  ;;  %3554 = vmatprep.mubr.msk.f32.mxu0 %vm3829_vm6, %v3825_v1 }
 0x4ff   : > { %3559 = vmatprep.mubr.msk.f32.mxu1 %vm3829_vm6, %v3825_v1  ;;  %3562 = vmatprep.subr.mxu0 %v3825_v1 }
 0x500   : > { %3560 = vmatmul.mubr.msk.f32.vlgmr.msra.gmra.mxu1 %vm1564_vm7, %v3716_v47  ;;  %3567 = vmatprep.subr.mxu1 %v3825_v1 }
 0x501   : > { %3555 = vmatmul.mubr.msk.f32.vlgmr.msra.gmra.mxu0 %vm1564_vm7, %v3718_v48  ;;  %3569 = vmatprep.mubr.msk.f32.mxu1 %vm3829_vm6, %v3825_v1  ;;  %v2810_v48 = vsub.s32 3, %v4043_v32 }
 0x502   : > { %3564 = vmatprep.mubr.msk.f32.mxu0 %vm3829_vm6, %v3825_v1  ;;  %3563 = vmatpush3.msra.mxu0 %v2486_v49  ;;  %v2815_v49 = vsub.s32 4, %v4043_v32 }
 0x503   : > { %3568 = vmatpush3.msra.mxu1 %v2487_v50  ;;  %3572 = vmatprep.subr.mxu0 %v3825_v1  ;;  %v2811_v50 = vrot.slane %v4047_v34, %v2810_v48 }
 0x504   : > { %3577 = vmatprep.subr.mxu1 %v3825_v1 }
 0x5b2   : > { %v1975_v51 = vpop.f32.mrf.mxu0 }
 0x5b4   : > { %v3526_v52 = vpop.f32.mrf.mxu0  ;;  %v2048_v53 = vpop.f32.mrf.mxu1 }
 0x5b6   : > { %v3531_v54 = vpop.f32.mrf.mxu1 }
 0x5b8   : > { %v2194_v55 = vpop.f32.mrf.mxu1 }
 0x5b9   : > { %v2121_v56 = vpop.f32.mrf.mxu0 }
 0x5ba   : > { %v3541_v57 = vpop.f32.mrf.mxu1 }
 0x5bb   : > { %v3536_v58 = vpop.f32.mrf.mxu0  ;;  %v2925_v57 = vld [vmem:[%s4005_s4 + $0x70] sm:$0xff] }
 0x5bc   : > { %v2334_v59 = vpop.f32.mrf.mxu1  ;;  %v2924_v58 = vld [vmem:[%s4005_s4 + $0x68] sm:$0xff] }
 0x5bd   : > { %v2264_v60 = vpop.f32.mrf.mxu0  ;;  %3719 = vrcp.f32 %v2334_v59  ;;  %v2923_v59 = vld [vmem:[%s4005_s4 + $0x60] sm:$0xff] }
 0x5be   : > { %3721 = vrcp.f32 %v2264_v60  ;;  %v3551_v61 = vpop.f32.mrf.mxu1  ;;  %v2922_v60 = vld [vmem:[%s4005_s4 + $0x58] sm:$0xff] }
 0x5bf   : > { %v3546_v62 = vpop.f32.mrf.mxu0  ;;  %v2921_v61 = vld [vmem:[%s4005_s4 + $0x50] sm:$0xff] }
 0x5c0   : > { %v2474_v63 = vpop.f32.mrf.mxu1  ;;  %v2920_v62 = vld [vmem:[%s4005_s4 + $0x48] sm:$0xff] }
 0x5c1   : > { %v2404_v0 = vpop.f32.mrf.mxu0  ;;  %3723 = vrcp.f32 %v2474_v63  ;;  %v2919_v63 = vld [vmem:[%s4005_s4 + $0x40] sm:$0xff] }
 0x5c2   : > { %3725 = vrcp.f32 %v2404_v0  ;;  %v3561_v3 = vpop.f32.mrf.mxu1  ;;  %v2918_v0 = vld [vmem:[%s4005_s4 + $0x38] sm:$0xff] }
 0x5c3   : > { %v3556_v4 = vpop.f32.mrf.mxu0  ;;  %v2917_v3 = vld [vmem:[%s4005_s4 + $0x30] sm:$0xff] }
 0x5c4   : > { %v2916_v4 = vld [vmem:[%s4005_s4 + $0x28] sm:$0xff] }
 0x5ca   : > { %v3720_v5 = vpop.eup %3719 }
 0x5cb   : > { %v3722_v6 = vpop.eup %3721  ;;  %v2483_v7 = vmul.f32 %v3720_v5, %v2048_v53  ;;  %v2816_v53 = vrot.slane %v4047_v34, %v2815_v49  ;;  %v2915_v5 = vld [vmem:[%s4005_s4 + $0x20] sm:$0xff] }
 0x5cc   : > { %v2482_v9 = vmul.f32 %v3722_v6, %v1975_v51  ;;  %v2914_v6 = vld [vmem:[%s4005_s4 + $0x18] sm:$0xff] }
 0x5cd   : > { %3570 = vmatmul.mubr.msk.f32.vlgmr.msra.gmra.mxu1 %vm1564_vm7, %v2483_v7  ;;  %v2913_v7 = vld [vmem:[%s4005_s4 + $0x10] sm:$0xff] }
 0x5ce   : > { %v3724_v11 = vpop.eup %3723  ;;  %3565 = vmatmul.mubr.msk.f32.vlgmr.msra.gmra.mxu0 %vm1564_vm7, %v2482_v9  ;;  %3578 = vmatpush3.msra.mxu1 %v2489_v8  ;;  %v2912_v8 = vld [vmem:[%s4005_s4 + $0x8] sm:$0xff]  ;;  %v2911_v9 = vld [vmem:[%s4005_s4] sm:$0xff] }
 0x5cf   : > { %v3726_v12 = vpop.eup %3725  ;;  %3573 = vmatpush3.msra.mxu0 %v2488_v10  ;;  %3574 = vmatprep.mubr.msk.f32.mxu0 %vm3829_vm6, %v3825_v1  ;;  %v2485_v14 = vmul.f32 %v3724_v11, %v2194_v55  ;;  %v3236_v10 = vld [vmem:[%s462_s19] ss:$0 sm:$0xff] }
 0x5d0   : > { %3579 = vmatprep.mubr.msk.f32.mxu1 %vm3829_vm6, %v3825_v1  ;;  %v2484_v15 = vmul.f32 %v3726_v12, %v2121_v56  ;;  %3582 = vmatprep.subr.mxu0 %v3825_v1  ;;  %v2926_v56 = vld [vmem:[%s4005_s4 + $0x78] sm:$0xff] }
 0x5d1   : > { %3580 = vmatmul.mubr.msk.f32.vlgmr.msra.gmra.mxu1 %vm1564_vm7, %v2485_v14  ;;  %3593 = vmatprep.subr.mxu1 %v3825_v1 }
 0x5d2   : > { %3575 = vmatmul.mubr.msk.f32.vlgmr.msra.gmra.mxu0 %vm1564_vm7, %v2484_v15  ;;  %3625 = vmatprep.mubr.msk.f32.mxu1 %vm3829_vm6, %v3825_v1 }
 0x5d3   : > { %3590 = vmatprep.mubr.msk.f32.mxu0 %vm3829_vm6, %v3825_v1  ;;  %3583 = vmatpush3.msra.mxu0 %v2821_v42 }
 0x5d4   : > { %3584 = vmatprep.subr.mxu0 %v3825_v1  ;;  %3594 = vmatpush3.msra.mxu1 %v2926_v56 }
 0x5d5   : > { %3585 = vmatpush3.msra.mxu0 %v2820_v44  ;;  %3595 = vmatprep.subr.mxu1 %v3825_v1 }
 0x5d6   : > { %3586 = vmatprep.subr.mxu0 %v3825_v1  ;;  %3596 = vmatpush3.msra.mxu1 %v2925_v57 }
 0x5d7   : > { %3597 = vmatprep.subr.mxu1 %v3825_v1 }
 0x5d8   : > { %3598 = vmatpush3.msra.mxu1 %v2924_v58 }
 0x5d9   : > { %3599 = vmatprep.subr.mxu1 %v3825_v1 }
 0x5da   : > { %3600 = vmatpush3.msra.mxu1 %v2923_v59 }
 0x5db   : > { %3601 = vmatprep.subr.mxu1 %v3825_v1 }
 0x5dc   : > { %3602 = vmatpush3.msra.mxu1 %v2922_v60 }
 0x5dd   : > { %3603 = vmatprep.subr.mxu1 %v3825_v1 }
 0x5de   : > { %3604 = vmatpush3.msra.mxu1 %v2921_v61 }
 0x5df   : > { %3605 = vmatprep.subr.mxu1 %v3825_v1 }
 0x5e0   : > { %3606 = vmatpush3.msra.mxu1 %v2920_v62 }
 0x5e1   : > { %3607 = vmatprep.subr.mxu1 %v3825_v1 }
 0x5e2   : > { %3608 = vmatpush3.msra.mxu1 %v2919_v63 }
 0x5e3   : > { %3609 = vmatprep.subr.mxu1 %v3825_v1 }
 0x5e4   : > { %3610 = vmatpush3.msra.mxu1 %v2918_v0 }
 0x5e5   : > { %3611 = vmatprep.subr.mxu1 %v3825_v1 }
 0x5e6   : > { %3612 = vmatpush3.msra.mxu1 %v2917_v3 }
 0x5e7   : > { %3613 = vmatprep.subr.mxu1 %v3825_v1 }
 0x5e8   : > { %3614 = vmatpush3.msra.mxu1 %v2916_v4 }
 0x5e9   : > { %3615 = vmatprep.subr.mxu1 %v3825_v1 }
 0x5ea   : > { %3616 = vmatpush3.msra.mxu1 %v2915_v5 }
 0x5eb   : > { %3617 = vmatprep.subr.mxu1 %v3825_v1 }
 0x5ec   : > { %3618 = vmatpush3.msra.mxu1 %v2914_v6 }
 0x5ed   : > { %3619 = vmatprep.subr.mxu1 %v3825_v1 }
 0x5ee   : > { %3620 = vmatpush3.msra.mxu1 %v2913_v7 }
 0x5ef   : > { %3621 = vmatprep.subr.mxu1 %v3825_v1 }
 0x5f0   : > { %3622 = vmatpush3.msra.mxu1 %v2912_v8 }
 0x5f1   : > { %3623 = vmatprep.subr.mxu1 %v3825_v1 }
 0x5f2   : > { %3624 = vmatpush3.msra.mxu1 %v2911_v9 }
 0x68d   : > { %v2632_v16 = vpop.f32.mrf.mxu1 }
 0x68e   : > { %v2559_v17 = vpop.f32.mrf.mxu0  ;;  %v2783_v19 = vsel %vm564_vm5, %v2632_v16, 0.0 }
 0x68f   : > { %v2782_v18 = vsel %vm564_vm5, %v2559_v17, 0.0  ;;  %v3571_v20 = vpop.f32.mrf.mxu1 }
 0x690   : > { %v3566_v21 = vpop.f32.mrf.mxu0  ;;  %v2784_v23 = vadd.f32 %v2783_v19, %v2782_v18 }
 0x691   : > { %v2778_v22 = vpop.f32.mrf.mxu1 }
 0x692   : > { %v2705_v24 = vpop.f32.mrf.mxu0  ;;  %v2787_v30 = vsel %vm564_vm5, %v2778_v22, 0.0 }
 0x693   : > { %v2785_v26 = vsel %vm564_vm5, %v2705_v24, 0.0  ;;  %v3581_v27 = vpop.f32.mrf.mxu1 }
 0x694   : > { %v2786_v28 = vadd.f32 %v2785_v26, %v2784_v23  ;;  %v3576_v29 = vpop.f32.mrf.mxu0 }
 0x696   : > { %v2788_v2 = vadd.f32 %v2787_v30, %v2786_v28 }
 0x698   : > { %v2789_v33 = vadd.f32 %v2788_v2, %v4015_v13  ;;  %v2819_v13 = vld [vmem:[%s3995_s22 + $0x8] sm:$0xff] }
 0x699   : > { %3587 = vmatpush3.msra.mxu0 %v2819_v13 }
 0x69a   : > { %v4284_v35 = vadd.f32 %v2793_v31, %v2789_v33  ;;  %3588 = vmatprep.subr.mxu0 %v3825_v1  ;;  %v2929_v1 = vsub.s32 5, %v4043_v32 }
 0x69b   : > { %3589 = vmatpush3.msra.mxu0 %v2818_v45 }
 0x69c   : > { %v2795_v36 = vsel %vm564_vm5, %v4284_v35, 0.0  ;;  %v2930_v24 = vrot.slane %v4047_v34, %v2929_v1 }
 0x69d   : > { %2796 = vadd.xlane.f32.xlu1 %v2795_v36 }
 0x726   : > { %v2797_v37 = vpop.xlane.xlu1 %2796 }
 0x727   : > { %v2798_v38 = vmul.f32 0.03125, %v2797_v37 }
 0x729   : > { %v2799_v39 = vsub.f32 %v4284_v35, %v2798_v38 }
 0x72b   : > { %v2800_v40 = vmul.f32 %v2799_v39, %v2799_v39 }
 0x72d   : > { %v2801_v41 = vsel %vm564_vm5, %v2800_v40, 0.0 }
 0x72e   : > { %2802 = vadd.xlane.f32.xlu1 %v2801_v41 }
 0x7b7   : > { %v2803_v46 = vpop.xlane.xlu1 %2802 }
 0x7b8   : > { %v2804_v43 = vmul.f32 0.03125, %v2803_v46 }
 0x7ba   : > { %v2805_v47 = vadd.f32 1e-05, %v2804_v43 }
 0x7bc   : > { %3727 = vrsqrt.f32 %v2805_v47 }
 0x7c9   : > { %v3728_v51 = vpop.eup %3727 }
 0x7ca   : > { %v2807_v52 = vmul.f32 %v3728_v51, %v2799_v39 }
 0x7cc   : > { %v2812_v54 = vmul.f32 %v2811_v50, %v2807_v52 }
 0x7ce   : > { %v2817_v55 = vadd.f32 %v2816_v53, %v2812_v54 }
 0x7d0   : > { %3591 = vmatmul.mubr.msk.f32.vlgmr.msra.gmra.mxu0 %vm564_vm5, %v2817_v55 }
 0x890   : > { %v2898_v11 = vpop.f32.mrf.mxu0 }
 0x891   : > { %v2899_v12 = vadd.f32 %v3236_v10, %v2898_v11 }
 0x892   : > { %v3592_v14 = vpop.f32.mrf.mxu0 }
 0x893   : > { %v2902_v15 = vmul.f32 %v2899_v12, %v2899_v12 }
 0x895   : > { %v2903_v16 = vmul.f32 %v2902_v15, %v2899_v12 }
 0x897   : > { %v2904_v17 = vmul.f32 0.044715, %v2903_v16 }
 0x899   : > { %v2905_v18 = vadd.f32 %v2904_v17, %v2899_v12 }
 0x89b   : > { %v2906_v19 = vmul.f32 0.7978846, %v2905_v18 }
 0x89d   : > { %3729 = vtanh.f32 %v2906_v19 }
 0x8aa   : > { %v3730_v20 = vpop.eup %3729 }
 0x8ab   : > { %v2908_v21 = vadd.f32 1.0, %v3730_v20 }
 0x8ad   : > { %v2909_v22 = vmul.f32 0.5, %v2908_v21 }
 0x8af   : > { %v2910_v23 = vmul.f32 %v2909_v22, %v2899_v12 }
 0x8b1   : > { %3626 = vmatmul.mubr.f32.vlgmr.msra.gmra.mxu1 %v2910_v23 }
 0x971   : > { %v2997_v25 = vpop.f32.mrf.mxu1 }
 0x972   : > { %v2998_v26 = vadd.f32 %v2997_v25, %v2930_v24  ;;  %3006 = sbr.rel (%p3238_p1) target bundleno = 2424 (0x978), region = 64 }
 0x973   : > { %v3627_v27 = vpop.f32.mrf.mxu1 }
 0x974   : > { %v3001_v28 = vadd.f32 %v2998_v26, %v4284_v35 }
 0x976   : > { %3002 = vst.msk [vmem:[#allocation2] sm:$0xff] %vm564_vm5, %v3001_v28 }
 0x977   : > { %3007 = vst.msk [vmem:[%s432_s16] sm:$0xff] %vm564_vm5, %v3001_v28 }
 0x978 PF: > { %s3240_s4 = sshll.u32 %s3811_s13, 7  ;;  %s3022_s17 = sshll.u32 %s432_s16, 4  ;;  %s3023_s17 = int_to_ptr.vmem [resolvable:$true] %s3022_s17 }
 0x979   : > { %s3020_s29 = scalar_lea.hbm %s4403_s9, %s3240_s4  ;;  %s4432_s14 = sand.u32 1, %s3799_s10  }
 0x97a   : > { %s3009_s12 = scalar_lea.sflag [#allocation4], %s4432_s14  ;;  %s3731_s15 = scalar_lea.vmem %s3023_s17, 128 }
 0x97b   : > { %p3732_p2 = scmp.ne.s32.totalorder %s3023_s17, %s3731_s15  ;;  %s3831_s20 = smov [#allocation3]  }
 0x97c   : > { %s3735_s11 = sshll.u32 %s3831_s20, 4  ;;  %s3736_s11 = int_to_ptr.vmem [resolvable:$false] %s3735_s11 }
 0x97d   : > { %p3733_p4 = pnand %p3732_p2, %p3931_p3  ;;  %s3737_s22 = scalar_lea.vmem %s3736_s11, 256 }
 0x97e   : > { %p3738_p6 = scmp.lt.s32.totalorder %s3023_s17, %s3736_s11  ;;  %p3739_p7 = scmp.lt.s32.totalorder %s3737_s22, %s3731_s15 }
 0x97f   : > { %p3734_p5 = pneg %p3733_p4 }
 0x980   : > { %p3740_p8 = por %p3739_p7, %p3738_p6 }
 0x982   : > { %p3741_p10 = pnand %p3740_p8, %p3734_p5 }
 0x984   : > { %3744 = shalt.err (!%p3741_p10)
}
 0x985   : > { %s3745_s13 = scalar_lea.hbm %s3020_s29, 128  ;;  %s3749_s19 = scalar_lea.hbm %s4403_s9, 256 }
 0x986   : > { %p3746_p11 = scmp.ne.s32.totalorder %s3020_s29, %s3745_s13  ;;  %p3750_p0 = scmp.lt.s32.totalorder %s3020_s29, %s4403_s9 }
 0x987   : > { %p3751_p1 = scmp.lt.s32.totalorder %s3749_s19, %s3745_s13 }
 0x988   : > { %p3747_p12 = pnand %p3746_p11, %p3931_p3 }
 0x989   : > { %p3752_p2 = por %p3751_p1, %p3750_p0 }
 0x98a   : > { %p3748_p13 = pneg %p3747_p12 }
 0x98c   : > { %p3753_p4 = pnand %p3752_p2, %p3748_p13 }
 0x98e   : > { %3756 = shalt.err (!%p3753_p4)
}
 0x98f   : > { %3630 = dma.vmem_to_hbm [thread:$0]  (%p3931_p3), %s3023_s17, 128, %s3020_s29, %s3009_s12  }
 0x990 PF: > { %s4433_s23 = sld [smem:[#allocation10_spill]] }
 0x991   : > { %s4434_s24 = sld [smem:[#allocation6_spill]] }
 0x996   : > { %p3636_p5 = scmp.ge.s32.totalorder %s4433_s23, 2 }
 0x997   : > { %s3034_s2 = sand.u32 1, %s4434_s24  }
 0x998   : > { %p3633_p6 = pnand %p3636_p5, %p3941_p9  ;;  %s3035_s3 = scalar_lea.sflag [#allocation4], %s3034_s2 }
 0x99a   : > { %p3634_p7 = pneg %p3633_p6 }
 0x99c   : > { %3790 = dma.done.wait (%p3634_p7), %s3035_s3, 128  }
 0x99d   : > { %3792 = vsyncadd (%p3634_p7), %s3035_s3, 4294967168  ;;  %s22_s16 = sadd.s32 1, %s4433_s23   ;;  %s4436_s4 = sld [smem:[#allocation7_spill]] }
 0x99e   : > { %p19_p8 = scmp.ge.s32.totalorder %s22_s16, 6   ;;  %s4437_s11 = sld [smem:[#allocation14_spill]] }
 0x99f   : > { %s4438_s12 = sld [smem:[#allocation8_spill]]  ;;  %s4442_s30 = smov %s3799_s10 }
 0x9a0   : > { %s4439_s13 = sld [smem:[#allocation9_spill]]  ;;  %21 = sbr.rel (!%p19_p8) target bundleno = 10 (0xa), region = 120 }
 0x9a1   : > { %s4440_s14 = sld [smem:[#allocation11_spill]] }
 0x9a2   : > { %s4441_s15 = sld [smem:[#allocation12_spill]] }
 0x9a3   : > { %s4443_s10 = smov %s4436_s4 }
 0x9a5   :  { %3040 = vsyncpa [#allocation4], 1 }
 0x9a6   :  { %3042 = vsyncpa [#allocation4 + $0x1], 1 }

</bundles_post_ra>
